<compile_context>
chip_gen: v7x
topology: tpu7x:2x2x1
jax: 0.10.0
libtpu: 0.0.40
codegen_flags: <defaults>
</compile_context>

<pallas_src>
import functools

import jax
import jax.numpy as jnp
from jax import lax
from jax.experimental import pallas as pl
from jax.experimental.pallas import tpu as pltpu


# _TAP_GROUPS[phase][p] = 3x3 tap indices (along one axis) whose upsampled
# source pixel collapses onto original-resolution offset p for that phase.
_TAP_GROUPS = {0: ((0,), (1, 2)), 1: ((0, 1), (2,))}


def _round_up(x, m):
    return (x + m - 1) // m * m


def _phase_weights(conv_w):
    """PyTorch OIHW (C_out, C_in, 3, 3) -> (4, 4*C_in, C_out) bf16.

    For each output phase (a, b) the four effective 2x2 kernels (p, q) are
    pre-summed from the 3x3 taps and stacked along the contraction dim in
    (p, q) order, so the kernel does a single K = 4*C_in matmul per phase.
    """
    w = conv_w.astype(jnp.float32)
    phases = []
    for a in range(2):
        for b in range(2):
            blocks = []
            for p in range(2):
                for q in range(2):
                    acc = None
                    for ky in _TAP_GROUPS[a][p]:
                        for kx in _TAP_GROUPS[b][q]:
                            t = w[:, :, ky, kx]                 # (C_out, C_in)
                            acc = t if acc is None else acc + t
                    blocks.append(acc.T)                        # (C_in, C_out)
            phases.append(jnp.concatenate(blocks, axis=0))      # (4*C_in, C_out)
    return jnp.stack(phases, axis=0).astype(jnp.bfloat16)       # (4, 4*C_in, C_out)


def _pick_row_block(N, H, W, C_in, C_out, lane_unit, budget_bytes):
    """Largest divisor r of H whose output tile is legal (r*W multiple of
    `lane_unit`, or the whole image) and whose lane-padded per-step working set
    fits `budget_bytes`.  Prefers >=2 total grid blocks (v7x megacore)."""
    ci = max(128, _round_up(C_in, 128))          # lane-padded VMEM widths
    co = max(128, _round_up(C_out, 128))
    k4 = max(128, _round_up(4 * C_in, 128))
    bf, f32 = 2, 4

    def est(r):
        in_blk = 2 * r * (W + 2) * ci * bf        # main block, double-buffered
        halo = 2 * 2 * (W + 2) * ci * bf          # two halo rows, double-buffered
        slab = (r + 2) * (W + 2) * ci * bf        # concatenated slab copy
        cshift = 3 * (r + 2) * W * ci * bf        # 3 column-shifted slabs
        lhs = 2 * r * W * k4 * bf                 # packed per-phase LHS (+slack)
        accs = 3 * r * W * co * f32               # f32 acc, acc*acc, cast temp
        tpose = r * W * co * bf                   # transposed store temp
        out_blk = 2 * 4 * r * W * co * bf         # bf16 y block, double-buffered
        return in_blk + halo + slab + cshift + lhs + accs + tpose + out_blk

    cands = []
    for r in range(1, H + 1):
        if H % r:
            continue
        if (r * W) % lane_unit != 0 and r != H:
            continue
        cands.append(r)

    fitting = [r for r in cands if est(r) <= budget_bytes]
    if not fitting:
        # TODO(synk): masked-store fallback for shapes where no legal tile fits
        # the VMEM budget; take the smallest legal tile for now.
        return min(cands)
    r = max(fitting)
    if N * (H // r) < 2:                          # v7x: keep both TCs busy
        smaller = [c for c in fitting if N * (H // c) >= 2]
        if smaller:
            r = max(smaller)
    return r


def _phase_conv_kernel(weff_ref, xmain_ref, xhalo0_ref, xhalo1_ref,
                       y_ref, stats_ref, *, r, W, C_in, C_out, transpose_out):
    """One (batch n, row-block hb) grid step.

    Computes the 3x3-conv-on-x2-upsampled output for `r` original rows as four
    sub-pixel phases; each phase is ONE bf16 matmul with K = 4*C_in
    (windows channel-packed, weights pre-stacked).  Accumulates per-channel
    sum / sum-of-squares partials for BatchNorm in f32 and stores the conv
    output as bf16.  Conv bias is intentionally omitted (cancelled by BN).
    """
    # (r+2, W+2, C_in) zero-padded original-resolution slab, kept in bf16.
    slab = jnp.concatenate(
        [xmain_ref[0], xhalo0_ref[0], xhalo1_ref[0]], axis=0)
    # 3 column-shifted slabs; every window is a leading-dim slice of one.
    colshift = [slab[:, v:v + W, :] for v in range(3)]          # (r+2, W, C_in)

    s_acc = jnp.zeros((1, C_out), jnp.float32)
    sq_acc = jnp.zeros((1, C_out), jnp.float32)

    for a in range(2):              # output row phase (2i + a)
        for b in range(2):          # output col phase (2j + b)
            # Channel-pack the four (p, q) windows -> (r*W, 4*C_in) bf16 LHS,
            # order matching the stacked weights: (0,0),(0,1),(1,0),(1,1).
            lhs = jnp.concatenate(
                [colshift[b][a:a + r],
                 colshift[b + 1][a:a + r],
                 colshift[b][a + 1:a + 1 + r],
                 colshift[b + 1][a + 1:a + 1 + r]],
                axis=-1).reshape(r * W, 4 * C_in)
            acc = jnp.dot(lhs, weff_ref[a * 2 + b],
                          preferred_element_type=jnp.float32)   # (r*W, C_out) f32

            s_acc = s_acc + jnp.sum(acc, axis=0, keepdims=True)
            sq_acc = sq_acc + jnp.sum(acc * acc, axis=0, keepdims=True)

            if transpose_out:
                # Small C_out: lane-dense store needs spatial on the lane axis.
                y_ref[0, a * 2 + b] = acc.T.astype(y_ref.dtype)
            else:
                # C_out % 128 == 0: (r*W, C_out) is already lane-dense.
                y_ref[0, a * 2 + b] = acc.astype(y_ref.dtype)

    # Packed BN partials: row 0 = [sum | sumsq], rows 1..7 = 0 (glue sums all
    # rows, so nothing relies on rows being ignored).
    stats_row = jnp.concatenate([s_acc, sq_acc], axis=-1)        # (1, 2*C_out)
    rows = lax.broadcasted_iota(jnp.int32, (8, 2 * C_out), 0)
    stats_ref[0, 0] = jnp.where(rows == 0,
                                jnp.broadcast_to(stats_row, (8, 2 * C_out)),
                                jnp.zeros((8, 2 * C_out), jnp.float32))


def up_conv_forward(x_nchw, conv_w, conv_b, gamma, beta, eps=1e-5):
    N, C_in, H, W = x_nchw.shape
    C_out = conv_w.shape[0]
    assert conv_w.shape == (C_out, C_in, 3, 3), conv_w.shape
    assert conv_b.shape == (C_out,), conv_b.shape
    del conv_b  # exactly cancelled by training-mode BatchNorm mean subtraction

    transpose_out = (C_out % 128) != 0
    lane_unit = 128 if transpose_out else 8

    # Generation-aware VMEM sizing (v7x: 64 MiB physical; v5e/v6e: 128 MiB).
    try:
        vmem_cap = pltpu.get_tpu_info().vmem_capacity_bytes
    except Exception:
        vmem_cap = 64 * 1024 * 1024                   # v7x-safe fallback
    if vmem_cap <= 64 * 1024 * 1024:
        budget_bytes, vmem_limit = 18 << 20, 48 << 20
    else:
        budget_bytes, vmem_limit = 56 << 20, 100 << 20

    r = _pick_row_block(N, H, W, C_in, C_out, lane_unit, budget_bytes)
    n_hblk = H // r

    # Glue: NCHW -> zero-padded NHWC bf16.  This is the only full-size input
    # materialization; upsample + im2col are folded into the kernel via the
    # sub-pixel phase decomposition.
    # TODO(synk): handle the 1-pixel zero border in-kernel to skip this pad.
    x_pad = jnp.pad(jnp.transpose(x_nchw, (0, 2, 3, 1)).astype(jnp.bfloat16),
                    ((0, 0), (1, 1), (1, 1), (0, 0)))

    weff = _phase_weights(conv_w)                      # (4, 4*C_in, C_out) bf16

    kernel = functools.partial(_phase_conv_kernel, r=r, W=W, C_in=C_in,
                               C_out=C_out, transpose_out=transpose_out)

    if transpose_out:
        y_shape = jax.ShapeDtypeStruct((N, 4, C_out, H * W), jnp.bfloat16)
        y_spec = pl.BlockSpec((1, 4, C_out, r * W), lambda n, hb: (n, 0, 0, hb))
    else:
        y_shape = jax.ShapeDtypeStruct((N, 4, H * W, C_out), jnp.bfloat16)
        y_spec = pl.BlockSpec((1, 4, r * W, C_out), lambda n, hb: (n, 0, hb, 0))

    stats_shape = jax.ShapeDtypeStruct((N, n_hblk, 8, 2 * C_out), jnp.float32)
    stats_spec = pl.BlockSpec((1, 1, 8, 2 * C_out), lambda n, hb: (n, hb, 0, 0))

    flops = 2 * N * 4 * H * W * (4 * C_in) * C_out
    bytes_accessed = (x_pad.size * 2 + weff.size * 2
                      + N * 4 * H * W * C_out * 2
                      + N * n_hblk * 8 * 2 * C_out * 4)

    y, stats = pl.pallas_call(
        kernel,
        out_shape=(y_shape, stats_shape),
        grid=(N, n_hblk),
        in_specs=[
            pl.BlockSpec((4, 4 * C_in, C_out), lambda n, hb: (0, 0, 0)),        # weights
            pl.BlockSpec((1, r, W + 2, C_in), lambda n, hb: (n, hb, 0, 0)),     # main rows
            pl.BlockSpec((1, 1, W + 2, C_in), lambda n, hb: (n, hb * r + r, 0, 0)),      # halo 0
            pl.BlockSpec((1, 1, W + 2, C_in), lambda n, hb: (n, hb * r + r + 1, 0, 0)),  # halo 1
        ],
        out_specs=(y_spec, stats_spec),
        compiler_params=pltpu.CompilerParams(
            dimension_semantics=("parallel", "parallel"),
            vmem_limit_bytes=vmem_limit),
        cost_estimate=pl.CostEstimate(flops=flops, transcendentals=0,
                                      bytes_accessed=bytes_accessed),
    )(weff, x_pad, x_pad, x_pad)

    # BatchNorm2d training-mode batch statistics (biased variance) from the
    # per-block partials (f32).
    # TODO(synk): for very large N*H*W switch to a shifted/two-pass variance.
    count = N * 4 * H * W
    stat = jnp.sum(stats, axis=(0, 1, 2))              # (2*C_out,)
    mean = stat[:C_out] / count
    var = jnp.maximum(stat[C_out:] / count - mean * mean, 0.0)
    scale = gamma.astype(jnp.float32) * lax.rsqrt(var + eps)
    shift = beta.astype(jnp.float32) - mean * scale

    # BN affine + ReLU + sub-pixel phase interleave as ONE fused XLA pass over
    # the bf16 conv output.
    if transpose_out:
        y6 = y.reshape(N, 2, 2, C_out, H, W).astype(jnp.float32)
        y6 = jnp.maximum(y6 * scale.reshape(1, 1, 1, C_out, 1, 1)
                         + shift.reshape(1, 1, 1, C_out, 1, 1), 0.0)
        out = jnp.transpose(y6, (0, 3, 4, 1, 5, 2)).reshape(N, C_out, 2 * H, 2 * W)
    else:
        y6 = y.reshape(N, 2, 2, H, W, C_out).astype(jnp.float32)
        y6 = jnp.maximum(y6 * scale.reshape(1, 1, 1, 1, 1, C_out)
                         + shift.reshape(1, 1, 1, 1, 1, C_out), 0.0)
        out = jnp.transpose(y6, (0, 5, 3, 1, 4, 2)).reshape(N, C_out, 2 * H, 2 * W)
    return out


def _reference(x_nchw, conv_w, conv_b, gamma, beta, eps=1e-5):
    """Pure-JAX (f32) reference of the PyTorch forward pass."""
    x = jnp.transpose(x_nchw, (0, 2, 3, 1)).astype(jnp.float32)
    up = jnp.repeat(jnp.repeat(x, 2, axis=1), 2, axis=2)
    w_hwio = jnp.transpose(conv_w, (2, 3, 1, 0)).astype(jnp.float32)
    y = jax.lax.conv_general_dilated(
        up, w_hwio, window_strides=(1, 1), padding="SAME",
        dimension_numbers=("NHWC", "HWIO", "NHWC"),
        precision=jax.lax.Precision.HIGHEST,
        preferred_element_type=jnp.float32)
    y = y + conv_b.reshape(1, 1, 1, -1)
    mean = jnp.mean(y, axis=(0, 1, 2), keepdims=True)
    var = jnp.mean((y - mean) ** 2, axis=(0, 1, 2), keepdims=True)  # biased
    yn = (y - mean) * jax.lax.rsqrt(var + eps)
    yn = yn * gamma.reshape(1, 1, 1, -1) + beta.reshape(1, 1, 1, -1)
    return jnp.transpose(jnp.maximum(yn, 0.0), (0, 3, 1, 2))


if __name__ == "__main__":
    key = jax.random.PRNGKey(0)
    k_x, k_w, k_b, k_g, k_beta = jax.random.split(key, 5)

    N, C_in, C_out, H, W = 2, 4, 8, 16, 16
    x = jax.random.normal(k_x, (N, C_in, H, W), dtype=jnp.float32)

    # deterministic synthetic parameters (shapes from nn.Conv2d / nn.BatchNorm2d)
    conv_w = 0.1 * jax.random.normal(k_w, (C_out, C_in, 3, 3), dtype=jnp.float32)
    conv_b = 0.1 * jax.random.normal(k_b, (C_out,), dtype=jnp.float32)
    gamma = 1.0 + 0.1 * jax.random.normal(k_g, (C_out,), dtype=jnp.float32)
    beta = 0.1 * jax.random.normal(k_beta, (C_out,), dtype=jnp.float32)

    fwd = jax.jit(up_conv_forward)
    out = jax.block_until_ready(fwd(x, conv_w, conv_b, gamma, beta))
    assert out.shape == (N, C_out, 2 * H, 2 * W), out.shape

    ref = jax.block_until_ready(_reference(x, conv_w, conv_b, gamma, beta))
    # Tolerance reflects the deliberate bf16 quantization of the conv input AND
    # of the conv intermediate (review item); all matmul accumulation and BN
    # statistics are f32.
    assert jnp.allclose(out, ref, rtol=2e-2, atol=4e-2), \
        float(jnp.max(jnp.abs(out - ref)))

    print("KERNEL_OK")
</pallas_src>

<mosaic_0001>
module attributes {stable_mosaic.version = 11 : i64} {
  func.func @_phase_conv_kernel(%arg0: i32, %arg1: i32, %arg2: memref<4x16x8xbf16, #tpu.memory_space<vmem>>, %arg3: memref<1x16x18x4xbf16, #tpu.memory_space<vmem>>, %arg4: memref<1x1x18x4xbf16, #tpu.memory_space<vmem>>, %arg5: memref<1x1x18x4xbf16, #tpu.memory_space<vmem>>, %arg6: memref<1x4x8x256xbf16, #tpu.memory_space<vmem>>, %arg7: memref<1x1x8x16xf32, #tpu.memory_space<vmem>>) attributes {dimension_semantics = [#tpu.dimension_semantics<parallel>, #tpu.dimension_semantics<parallel>], iteration_bounds = array<i64: 2, 1>, scalar_prefetch = 0 : i64, scratch_operands = 0 : i64, tpu.core_type = #tpu.core_type<tc>, window_params = [{pipeline_mode = #tpu.pipeline_mode<synchronous>, transform_indices = @transform_0, window_bounds = array<i64: 4, 16, 8>}, {transform_indices = @transform_1, window_bounds = array<i64: 1, 16, 18, 4>}, {transform_indices = @transform_2, window_bounds = array<i64: 1, 1, 18, 4>}, {transform_indices = @transform_3, window_bounds = array<i64: 1, 1, 18, 4>}, {transform_indices = @transform_4, window_bounds = array<i64: 1, 4, 8, 256>}, {transform_indices = @transform_5, window_bounds = array<i64: 1, 1, 8, 16>}]} {
    %c0 = arith.constant 0 : index
    %c0_0 = arith.constant 0 : index
    %c0_1 = arith.constant 0 : index
    %c0_2 = arith.constant 0 : index
    %0 = vector.load %arg3[%c0, %c0_0, %c0_1, %c0_2] : memref<1x16x18x4xbf16, #tpu.memory_space<vmem>>, vector<1x16x18x4xbf16>
    %1 = vector.shape_cast %0 : vector<1x16x18x4xbf16> to vector<16x18x4xbf16>
    %c0_3 = arith.constant 0 : index
    %c0_4 = arith.constant 0 : index
    %c0_5 = arith.constant 0 : index
    %c0_6 = arith.constant 0 : index
    %2 = vector.load %arg4[%c0_3, %c0_4, %c0_5, %c0_6] : memref<1x1x18x4xbf16, #tpu.memory_space<vmem>>, vector<1x1x18x4xbf16>
    %3 = vector.shape_cast %2 : vector<1x1x18x4xbf16> to vector<1x18x4xbf16>
    %c0_7 = arith.constant 0 : index
    %c0_8 = arith.constant 0 : index
    %c0_9 = arith.constant 0 : index
    %c0_10 = arith.constant 0 : index
    %4 = vector.load %arg5[%c0_7, %c0_8, %c0_9, %c0_10] : memref<1x1x18x4xbf16, #tpu.memory_space<vmem>>, vector<1x1x18x4xbf16>
    %5 = vector.shape_cast %4 : vector<1x1x18x4xbf16> to vector<1x18x4xbf16>
    %6 = tpu.concatenate %1, %3, %5 in 0 : vector<16x18x4xbf16>, vector<1x18x4xbf16>, vector<1x18x4xbf16> -> vector<18x18x4xbf16>
    %7 = vector.extract_strided_slice %6 {offsets = [0, 0, 0], sizes = [18, 16, 4], strides = [1, 1, 1]} : vector<18x18x4xbf16> to vector<18x16x4xbf16>
    %8 = vector.extract_strided_slice %6 {offsets = [0, 1, 0], sizes = [18, 16, 4], strides = [1, 1, 1]} : vector<18x18x4xbf16> to vector<18x16x4xbf16>
    %9 = vector.extract_strided_slice %6 {offsets = [0, 2, 0], sizes = [18, 16, 4], strides = [1, 1, 1]} : vector<18x18x4xbf16> to vector<18x16x4xbf16>
    %cst = arith.constant 0.000000e+00 : f32
    %10 = vector.broadcast %cst : f32 to vector<1x8xf32>
    %cst_11 = arith.constant 0.000000e+00 : f32
    %11 = vector.broadcast %cst_11 : f32 to vector<1x8xf32>
    %12 = vector.extract_strided_slice %7 {offsets = [0, 0, 0], sizes = [16, 16, 4], strides = [1, 1, 1]} : vector<18x16x4xbf16> to vector<16x16x4xbf16>
    %13 = vector.extract_strided_slice %8 {offsets = [0, 0, 0], sizes = [16, 16, 4], strides = [1, 1, 1]} : vector<18x16x4xbf16> to vector<16x16x4xbf16>
    %14 = vector.extract_strided_slice %7 {offsets = [1, 0, 0], sizes = [16, 16, 4], strides = [1, 1, 1]} : vector<18x16x4xbf16> to vector<16x16x4xbf16>
    %15 = vector.extract_strided_slice %8 {offsets = [1, 0, 0], sizes = [16, 16, 4], strides = [1, 1, 1]} : vector<18x16x4xbf16> to vector<16x16x4xbf16>
    %16 = tpu.concatenate %12, %13, %14, %15 in 2 : vector<16x16x4xbf16>, vector<16x16x4xbf16>, vector<16x16x4xbf16>, vector<16x16x4xbf16> -> vector<16x16x16xbf16>
    %17 = vector.shape_cast %16 : vector<16x16x16xbf16> to vector<256x16xbf16>
    %c0_12 = arith.constant 0 : index
    %c0_13 = arith.constant 0 : index
    %c0_14 = arith.constant 0 : index
    %18 = vector.load %arg2[%c0_12, %c0_13, %c0_14] : memref<4x16x8xbf16, #tpu.memory_space<vmem>>, vector<1x16x8xbf16>
    %19 = vector.shape_cast %18 : vector<1x16x8xbf16> to vector<16x8xbf16>
    %cst_15 = arith.constant dense<0.000000e+00> : vector<256x8xf32>
    %20 = tpu.matmul %17, %19, %cst_15 {dimension_numbers = #tpu.dot_dimension_numbers<[1], [0], [0], [1], [0, 0, 1, 1], [], []>} : vector<256x16xbf16>, vector<16x8xbf16>, vector<256x8xf32> -> vector<256x8xf32>
    %cst_16 = arith.constant dense<0.000000e+00> : vector<8xf32>
    %21 = vector.multi_reduction <add>, %20, %cst_16 [0] : vector<256x8xf32> to vector<8xf32>
    %22 = vector.shape_cast %21 : vector<8xf32> to vector<1x8xf32>
    %23 = arith.addf %10, %22 : vector<1x8xf32>
    %24 = arith.mulf %20, %20 : vector<256x8xf32>
    %cst_17 = arith.constant dense<0.000000e+00> : vector<8xf32>
    %25 = vector.multi_reduction <add>, %24, %cst_17 [0] : vector<256x8xf32> to vector<8xf32>
    %26 = vector.shape_cast %25 : vector<8xf32> to vector<1x8xf32>
    %27 = arith.addf %11, %26 : vector<1x8xf32>
    %28 = tpu.transpose %20, [1, 0] : vector<256x8xf32> -> vector<8x256xf32>
    %29 = arith.truncf %28 : vector<8x256xf32> to vector<8x256xbf16>
    %c0_18 = arith.constant 0 : index
    %c0_19 = arith.constant 0 : index
    %c0_20 = arith.constant 0 : index
    %c0_21 = arith.constant 0 : index
    %30 = vector.load %arg6[%c0_18, %c0_19, %c0_20, %c0_21] : memref<1x4x8x256xbf16, #tpu.memory_space<vmem>>, vector<1x1x8x256xbf16>
    %31 = vector.shape_cast %30 : vector<1x1x8x256xbf16> to vector<8x256xbf16>
    %32 = vector.shape_cast %29 : vector<8x256xbf16> to vector<1x1x8x256xbf16>
    tpu.vector_store %arg6[%c0_18, %c0_19, %c0_20, %c0_21], %32 {strides = array<i32>} : memref<1x4x8x256xbf16, #tpu.memory_space<vmem>>, vector<1x1x8x256xbf16>,
    %33 = vector.extract_strided_slice %8 {offsets = [0, 0, 0], sizes = [16, 16, 4], strides = [1, 1, 1]} : vector<18x16x4xbf16> to vector<16x16x4xbf16>
    %34 = vector.extract_strided_slice %9 {offsets = [0, 0, 0], sizes = [16, 16, 4], strides = [1, 1, 1]} : vector<18x16x4xbf16> to vector<16x16x4xbf16>
    %35 = vector.extract_strided_slice %8 {offsets = [1, 0, 0], sizes = [16, 16, 4], strides = [1, 1, 1]} : vector<18x16x4xbf16> to vector<16x16x4xbf16>
    %36 = vector.extract_strided_slice %9 {offsets = [1, 0, 0], sizes = [16, 16, 4], strides = [1, 1, 1]} : vector<18x16x4xbf16> to vector<16x16x4xbf16>
    %37 = tpu.concatenate %33, %34, %35, %36 in 2 : vector<16x16x4xbf16>, vector<16x16x4xbf16>, vector<16x16x4xbf16>, vector<16x16x4xbf16> -> vector<16x16x16xbf16>
    %38 = vector.shape_cast %37 : vector<16x16x16xbf16> to vector<256x16xbf16>
    %c1 = arith.constant 1 : index
    %c0_22 = arith.constant 0 : index
    %c0_23 = arith.constant 0 : index
    %39 = vector.load %arg2[%c1, %c0_22, %c0_23] : memref<4x16x8xbf16, #tpu.memory_space<vmem>>, vector<1x16x8xbf16>
    %40 = vector.shape_cast %39 : vector<1x16x8xbf16> to vector<16x8xbf16>
    %cst_24 = arith.constant dense<0.000000e+00> : vector<256x8xf32>
    %41 = tpu.matmul %38, %40, %cst_24 {dimension_numbers = #tpu.dot_dimension_numbers<[1], [0], [0], [1], [0, 0, 1, 1], [], []>} : vector<256x16xbf16>, vector<16x8xbf16>, vector<256x8xf32> -> vector<256x8xf32>
    %cst_25 = arith.constant dense<0.000000e+00> : vector<8xf32>
    %42 = vector.multi_reduction <add>, %41, %cst_25 [0] : vector<256x8xf32> to vector<8xf32>
    %43 = vector.shape_cast %42 : vector<8xf32> to vector<1x8xf32>
    %44 = arith.addf %23, %43 : vector<1x8xf32>
    %45 = arith.mulf %41, %41 : vector<256x8xf32>
    %cst_26 = arith.constant dense<0.000000e+00> : vector<8xf32>
    %46 = vector.multi_reduction <add>, %45, %cst_26 [0] : vector<256x8xf32> to vector<8xf32>
    %47 = vector.shape_cast %46 : vector<8xf32> to vector<1x8xf32>
    %48 = arith.addf %27, %47 : vector<1x8xf32>
    %49 = tpu.transpose %41, [1, 0] : vector<256x8xf32> -> vector<8x256xf32>
    %50 = arith.truncf %49 : vector<8x256xf32> to vector<8x256xbf16>
    %c0_27 = arith.constant 0 : index
    %c1_28 = arith.constant 1 : index
    %c0_29 = arith.constant 0 : index
    %c0_30 = arith.constant 0 : index
    %51 = vector.load %arg6[%c0_27, %c1_28, %c0_29, %c0_30] : memref<1x4x8x256xbf16, #tpu.memory_space<vmem>>, vector<1x1x8x256xbf16>
    %52 = vector.shape_cast %51 : vector<1x1x8x256xbf16> to vector<8x256xbf16>
    %53 = vector.shape_cast %50 : vector<8x256xbf16> to vector<1x1x8x256xbf16>
    tpu.vector_store %arg6[%c0_27, %c1_28, %c0_29, %c0_30], %53 {strides = array<i32>} : memref<1x4x8x256xbf16, #tpu.memory_space<vmem>>, vector<1x1x8x256xbf16>,
    %54 = vector.extract_strided_slice %7 {offsets = [1, 0, 0], sizes = [16, 16, 4], strides = [1, 1, 1]} : vector<18x16x4xbf16> to vector<16x16x4xbf16>
    %55 = vector.extract_strided_slice %8 {offsets = [1, 0, 0], sizes = [16, 16, 4], strides = [1, 1, 1]} : vector<18x16x4xbf16> to vector<16x16x4xbf16>
    %56 = vector.extract_strided_slice %7 {offsets = [2, 0, 0], sizes = [16, 16, 4], strides = [1, 1, 1]} : vector<18x16x4xbf16> to vector<16x16x4xbf16>
    %57 = vector.extract_strided_slice %8 {offsets = [2, 0, 0], sizes = [16, 16, 4], strides = [1, 1, 1]} : vector<18x16x4xbf16> to vector<16x16x4xbf16>
    %58 = tpu.concatenate %54, %55, %56, %57 in 2 : vector<16x16x4xbf16>, vector<16x16x4xbf16>, vector<16x16x4xbf16>, vector<16x16x4xbf16> -> vector<16x16x16xbf16>
    %59 = vector.shape_cast %58 : vector<16x16x16xbf16> to vector<256x16xbf16>
    %c2 = arith.constant 2 : index
    %c0_31 = arith.constant 0 : index
    %c0_32 = arith.constant 0 : index
    %60 = vector.load %arg2[%c2, %c0_31, %c0_32] : memref<4x16x8xbf16, #tpu.memory_space<vmem>>, vector<1x16x8xbf16>
    %61 = vector.shape_cast %60 : vector<1x16x8xbf16> to vector<16x8xbf16>
    %cst_33 = arith.constant dense<0.000000e+00> : vector<256x8xf32>
    %62 = tpu.matmul %59, %61, %cst_33 {dimension_numbers = #tpu.dot_dimension_numbers<[1], [0], [0], [1], [0, 0, 1, 1], [], []>} : vector<256x16xbf16>, vector<16x8xbf16>, vector<256x8xf32> -> vector<256x8xf32>
    %cst_34 = arith.constant dense<0.000000e+00> : vector<8xf32>
    %63 = vector.multi_reduction <add>, %62, %cst_34 [0] : vector<256x8xf32> to vector<8xf32>
    %64 = vector.shape_cast %63 : vector<8xf32> to vector<1x8xf32>
    %65 = arith.addf %44, %64 : vector<1x8xf32>
    %66 = arith.mulf %62, %62 : vector<256x8xf32>
    %cst_35 = arith.constant dense<0.000000e+00> : vector<8xf32>
    %67 = vector.multi_reduction <add>, %66, %cst_35 [0] : vector<256x8xf32> to vector<8xf32>
    %68 = vector.shape_cast %67 : vector<8xf32> to vector<1x8xf32>
    %69 = arith.addf %48, %68 : vector<1x8xf32>
    %70 = tpu.transpose %62, [1, 0] : vector<256x8xf32> -> vector<8x256xf32>
    %71 = arith.truncf %70 : vector<8x256xf32> to vector<8x256xbf16>
    %c0_36 = arith.constant 0 : index
    %c2_37 = arith.constant 2 : index
    %c0_38 = arith.constant 0 : index
    %c0_39 = arith.constant 0 : index
    %72 = vector.load %arg6[%c0_36, %c2_37, %c0_38, %c0_39] : memref<1x4x8x256xbf16, #tpu.memory_space<vmem>>, vector<1x1x8x256xbf16>
    %73 = vector.shape_cast %72 : vector<1x1x8x256xbf16> to vector<8x256xbf16>
    %74 = vector.shape_cast %71 : vector<8x256xbf16> to vector<1x1x8x256xbf16>
    tpu.vector_store %arg6[%c0_36, %c2_37, %c0_38, %c0_39], %74 {strides = array<i32>} : memref<1x4x8x256xbf16, #tpu.memory_space<vmem>>, vector<1x1x8x256xbf16>,
    %75 = vector.extract_strided_slice %8 {offsets = [1, 0, 0], sizes = [16, 16, 4], strides = [1, 1, 1]} : vector<18x16x4xbf16> to vector<16x16x4xbf16>
    %76 = vector.extract_strided_slice %9 {offsets = [1, 0, 0], sizes = [16, 16, 4], strides = [1, 1, 1]} : vector<18x16x4xbf16> to vector<16x16x4xbf16>
    %77 = vector.extract_strided_slice %8 {offsets = [2, 0, 0], sizes = [16, 16, 4], strides = [1, 1, 1]} : vector<18x16x4xbf16> to vector<16x16x4xbf16>
    %78 = vector.extract_strided_slice %9 {offsets = [2, 0, 0], sizes = [16, 16, 4], strides = [1, 1, 1]} : vector<18x16x4xbf16> to vector<16x16x4xbf16>
    %79 = tpu.concatenate %75, %76, %77, %78 in 2 : vector<16x16x4xbf16>, vector<16x16x4xbf16>, vector<16x16x4xbf16>, vector<16x16x4xbf16> -> vector<16x16x16xbf16>
    %80 = vector.shape_cast %79 : vector<16x16x16xbf16> to vector<256x16xbf16>
    %c3 = arith.constant 3 : index
    %c0_40 = arith.constant 0 : index
    %c0_41 = arith.constant 0 : index
    %81 = vector.load %arg2[%c3, %c0_40, %c0_41] : memref<4x16x8xbf16, #tpu.memory_space<vmem>>, vector<1x16x8xbf16>
    %82 = vector.shape_cast %81 : vector<1x16x8xbf16> to vector<16x8xbf16>
    %cst_42 = arith.constant dense<0.000000e+00> : vector<256x8xf32>
    %83 = tpu.matmul %80, %82, %cst_42 {dimension_numbers = #tpu.dot_dimension_numbers<[1], [0], [0], [1], [0, 0, 1, 1], [], []>} : vector<256x16xbf16>, vector<16x8xbf16>, vector<256x8xf32> -> vector<256x8xf32>
    %cst_43 = arith.constant dense<0.000000e+00> : vector<8xf32>
    %84 = vector.multi_reduction <add>, %83, %cst_43 [0] : vector<256x8xf32> to vector<8xf32>
    %85 = vector.shape_cast %84 : vector<8xf32> to vector<1x8xf32>
    %86 = arith.addf %65, %85 : vector<1x8xf32>
    %87 = arith.mulf %83, %83 : vector<256x8xf32>
    %cst_44 = arith.constant dense<0.000000e+00> : vector<8xf32>
    %88 = vector.multi_reduction <add>, %87, %cst_44 [0] : vector<256x8xf32> to vector<8xf32>
    %89 = vector.shape_cast %88 : vector<8xf32> to vector<1x8xf32>
    %90 = arith.addf %69, %89 : vector<1x8xf32>
    %91 = tpu.transpose %83, [1, 0] : vector<256x8xf32> -> vector<8x256xf32>
    %92 = arith.truncf %91 : vector<8x256xf32> to vector<8x256xbf16>
    %c0_45 = arith.constant 0 : index
    %c3_46 = arith.constant 3 : index
    %c0_47 = arith.constant 0 : index
    %c0_48 = arith.constant 0 : index
    %93 = vector.load %arg6[%c0_45, %c3_46, %c0_47, %c0_48] : memref<1x4x8x256xbf16, #tpu.memory_space<vmem>>, vector<1x1x8x256xbf16>
    %94 = vector.shape_cast %93 : vector<1x1x8x256xbf16> to vector<8x256xbf16>
    %95 = vector.shape_cast %92 : vector<8x256xbf16> to vector<1x1x8x256xbf16>
    tpu.vector_store %arg6[%c0_45, %c3_46, %c0_47, %c0_48], %95 {strides = array<i32>} : memref<1x4x8x256xbf16, #tpu.memory_space<vmem>>, vector<1x1x8x256xbf16>,
    %96 = tpu.concatenate %86, %90 in 1 : vector<1x8xf32>, vector<1x8xf32> -> vector<1x16xf32>
    %97 = tpu.iota {dimensions = array<i32: 0>} : vector<8x16xi32>
    %c0_i32 = arith.constant 0 : i32
    %98 = vector.broadcast %c0_i32 : i32 to vector<8x16xi32>
    %99 = arith.cmpi eq, %97, %98 : vector<8x16xi32>
    %100 = vector.shape_cast %96 : vector<1x16xf32> to vector<1x16xf32>
    %101 = vector.broadcast %100 : vector<1x16xf32> to vector<8x16xf32>
    %cst_49 = arith.constant 0.000000e+00 : f32
    %102 = vector.broadcast %cst_49 : f32 to vector<8x16xf32>
    %103 = arith.select %99, %101, %102 : vector<8x16xi1>, vector<8x16xf32>
    %c0_50 = arith.constant 0 : index
    %c0_51 = arith.constant 0 : index
    %c0_52 = arith.constant 0 : index
    %c0_53 = arith.constant 0 : index
    %104 = vector.load %arg7[%c0_50, %c0_51, %c0_52, %c0_53] : memref<1x1x8x16xf32, #tpu.memory_space<vmem>>, vector<1x1x8x16xf32>
    %105 = vector.shape_cast %104 : vector<1x1x8x16xf32> to vector<8x16xf32>
    %106 = vector.shape_cast %103 : vector<8x16xf32> to vector<1x1x8x16xf32>
    tpu.vector_store %arg7[%c0_50, %c0_51, %c0_52, %c0_53], %106 {strides = array<i32>} : memref<1x1x8x16xf32, #tpu.memory_space<vmem>>, vector<1x1x8x16xf32>,
    return
  }
  func.func @transform_0(%arg0: i32, %arg1: i32) -> (i32, i32, i32) {
    %c0_i32 = arith.constant 0 : i32
    %c0_i32_0 = arith.constant 0 : i32
    %c0_i32_1 = arith.constant 0 : i32
    %c0_i32_2 = arith.constant 0 : i32
    return %c0_i32, %c0_i32_0, %c0_i32_1 : i32, i32, i32
  }
  func.func @transform_1(%arg0: i32, %arg1: i32) -> (i32, i32, i32, i32) {
    %c0_i32 = arith.constant 0 : i32
    %c0_i32_0 = arith.constant 0 : i32
    %c0_i32_1 = arith.constant 0 : i32
    return %arg0, %arg1, %c0_i32, %c0_i32_0 : i32, i32, i32, i32
  }
  func.func @transform_2(%arg0: i32, %arg1: i32) -> (i32, i32, i32, i32) {
    %c16_i32 = arith.constant 16 : i32
    %0 = arith.muli %arg1, %c16_i32 : i32
    %c16_i32_0 = arith.constant 16 : i32
    %1 = arith.addi %0, %c16_i32_0 : i32
    %c0_i32 = arith.constant 0 : i32
    %c0_i32_1 = arith.constant 0 : i32
    %c0_i32_2 = arith.constant 0 : i32
    return %arg0, %1, %c0_i32, %c0_i32_1 : i32, i32, i32, i32
  }
  func.func @transform_3(%arg0: i32, %arg1: i32) -> (i32, i32, i32, i32) {
    %c16_i32 = arith.constant 16 : i32
    %0 = arith.muli %arg1, %c16_i32 : i32
    %c16_i32_0 = arith.constant 16 : i32
    %1 = arith.addi %0, %c16_i32_0 : i32
    %c1_i32 = arith.constant 1 : i32
    %2 = arith.addi %1, %c1_i32 : i32
    %c0_i32 = arith.constant 0 : i32
    %c0_i32_1 = arith.constant 0 : i32
    %c0_i32_2 = arith.constant 0 : i32
    return %arg0, %2, %c0_i32, %c0_i32_1 : i32, i32, i32, i32
  }
  func.func @transform_4(%arg0: i32, %arg1: i32) -> (i32, i32, i32, i32) {
    %c0_i32 = arith.constant 0 : i32
    %c0_i32_0 = arith.constant 0 : i32
    %c0_i32_1 = arith.constant 0 : i32
    return %arg0, %c0_i32, %c0_i32_0, %arg1 : i32, i32, i32, i32
  }
  func.func @transform_5(%arg0: i32, %arg1: i32) -> (i32, i32, i32, i32) {
    %c0_i32 = arith.constant 0 : i32
    %c0_i32_0 = arith.constant 0 : i32
    %c0_i32_1 = arith.constant 0 : i32
    return %arg0, %arg1, %c0_i32, %c0_i32_0 : i32, i32, i32, i32
  }
}

</mosaic_0001>

<bundles_post_ra>
// kernel: up_conv_forward.1
= control target key start
LH: loop header
LB: loop body
LE: loop exit
PB: predicated region body
PF: predicated region fallthrough
CT: control target
= control target key end

     0   :  { %s3997_s18 = smov 0   ;;  %s3999_s19 = smov 0   ;;  %s5854_s0 = inlined_call_operand.vmem [shape: bf16[4,16,8], index: 0, kind: input, shape index: {}]   ;;  %s5855_s1 = inlined_call_operand.vmem [shape: bf16[2,18,18,4], index: 1, kind: input, shape index: {}, may-alias: {1,2,3}]   ;;  %s5856_s2 = inlined_call_operand.vmem [shape: bf16[2,18,18,4], index: 2, kind: input, shape index: {}, may-alias: {1,2,3}]   ;;  %s5857_s3 = inlined_call_operand.vmem [shape: bf16[2,18,18,4], index: 3, kind: input, shape index: {}, may-alias: {1,2,3}]   ;;  %s5858_s4 = inlined_call_operand.vmem [shape: bf16[2,4,8,256], index: 4, kind: output, shape index: {0}]   ;;  %s5859_s5 = inlined_call_operand.vmem [shape: f32[2,1,8,16], index: 5, kind: output, shape index: {1}]  }
   0x1   :  { %s4001_s20 = smov 0  }
   0x2 LB: > { %s28_s21 = sadd.s32 1, %s3958_s19  ;;  %p3379_p0 = scmp.ge.s32.totalorder %s3962_s20, 1  ;;  %s3962_s20 = sphi %s4001_s20, %s16_s20   ;;  %s3958_s19 = sphi %s3999_s19, %s5910_s19   ;;  %s3954_s18 = sphi %s3997_s18, %s5909_s18  }
   0x3   : > { %p30_p1 = scmp.ge.s32.totalorder %s28_s21, 2  ;;  %p272_p2 = scmp.lt.s32.totalorder %s3962_s20, 3 }
   0x5   : > { %s5912_s21 = smov (%p30_p1, %s28_s21), 0  ;;  %p273_p3 = pnand %p3379_p0, %p272_p2 }
   0x7   : > { %276 = sbr.rel (%p273_p3) target bundleno = 826 (0x33a), region = 36 }
   0xe   : > { %p349_p4 = scmp.lt.s32.totalorder %s3954_s18, 1  ;;  %vm590_vm0 = vsmask.f32 7424  ;;  %s3964_s27 = smov 4   ;;  %vm899_vm1 = vcmask 31744   ;;  %vm932_vm2 = vcmask 64512  }
   0xf   : > { %s3965_s6 = smov 8   ;;  %s3966_s9 = smov 12   ;;  %vm965_vm3 = vcmask 97280   ;;  %vm1006_vm4 = vcmask 130048  }
  0x10   : > { %s5914_s18 = smov (!%p349_p4, %s3954_s18), 1 }
  0x11   : > { %s4018_s22 = smul.u32 216, %s5914_s18  ;;  %s3509_s24 = sshll.u32 %s5914_s18, 5 }
  0x12   : > { %s3385_s28 = sshll.u32 %s5914_s18, 3 }
  0x13   : > { %s4024_s25 = scalar_lea.vmem %s5855_s1, %s4018_s22  ;;  %s3506_s26 = sadd.s32 192, %s4018_s22 }
  0x14   : > { %v4027_v0 = vld [vmem:[%s4024_s25 + $0x18] sm:$0xff]   ;;  %v4030_v1 = vld [vmem:[%s4024_s25 + $0x20] ss:$0 sps:$4 sm:$0x11]   ;;  %v4046_v12 = vld [vmem:[%s4024_s25 + $0x24] sm:$0xff]   ;;  %s4234_s30 = scalar_lea.vmem %s5856_s2, %s3506_s26  ;;  %s3508_s14 = sadd.s32 204, %s4018_s22 }
  0x15   : > { %5879 = vst [vmem:[#allocation2_spill] sm:$0xff] %v4030_v1  ;;  %v4033_v2 = vld [vmem:[%s4024_s25] sm:$0xff]   ;;  %v616_v3 = vshrl.u32 %v4027_v0, 16  ;;  %v618_v4 = vshll.u32 %v4027_v0, 16  ;;  %v623_v5 = vshll.u32 %v4030_v1, 16  ;;  %v628_v17 = vshrl.u32 %v4046_v12, 16  ;;  %s387_s17 = scalar_lea.vmem %s5857_s3, %s3508_s14 }
  0x16   : > { %v4040_v6 = vld [vmem:[%s4024_s25 + $0x8] ss:$0 sps:$4 sm:$0x11]   ;;  %v592_v7 = vshrl.u32 %v4033_v2, 16  ;;  %v594_v8 = vshll.u32 %v4033_v2, 16  ;;  %v630_v18 = vshll.u32 %v4046_v12, 16 }
  0x17   : > { %v620_v9 = vrot.slane %v618_v4, 1  ;;  %v625_v10 = vrot.slane %v623_v5, 1  ;;  %v599_v11 = vshll.u32 %v4040_v6, 16  ;;  %v4049_v14 = vld [vmem:[%s4024_s25 + $0x2c] ss:$0 sps:$4 sm:$0x11]  }
  0x18   : > { %v596_v13 = vrot.slane %v594_v8, 1  ;;  %5880 = vst [vmem:[#allocation3_spill] sm:$0xff] %v4049_v14  ;;  %v4054_v19 = vld [vmem:[%s4024_s25 + $0xc] sm:$0xff]   ;;  %v635_v21 = vshll.u32 %v4049_v14, 16  ;;  %v632_v24 = vrot.slane %v630_v18, 1  ;;  %v4066_v27 = vld [vmem:[%s4024_s25 + $0x3c] sm:$0xff]  }
  0x19   : > { %v621_v15 = vor.u32 %v620_v9, %v616_v3  ;;  %v601_v16 = vrot.slane %v599_v11, 1  ;;  %v4058_v22 = vld [vmem:[%s4024_s25 + $0x14] ss:$0 sps:$4 sm:$0x11]   ;;  %v604_v25 = vshrl.u32 %v4054_v19, 16  ;;  %v606_v26 = vshll.u32 %v4054_v19, 16 }
  0x1a   : > { %v597_v20 = vor.u32 %v596_v13, %v592_v7  ;;  %v637_v29 = vrot.slane %v635_v21, 1  ;;  %v611_v30 = vshll.u32 %v4058_v22, 16  ;;  %v633_v31 = vor.u32 %v632_v24, %v628_v17  ;;  %v4074_v33 = vld [vmem:[%s4024_s25 + $0x44] ss:$0 sps:$4 sm:$0x11]   ;;  %v4079_v37 = vld [vmem:[%s4024_s25 + $0x30] sm:$0xff]  }
  0x1b   : > { %v4061_v23 = vsel %vm590_vm0, %v621_v15, %v625_v10  ;;  %v608_v32 = vrot.slane %v606_v26, 1  ;;  %5881 = vst [vmem:[#allocation4_spill] sm:$0xff] %v4074_v33  ;;  %v652_v34 = vshrl.u32 %v4066_v27, 16  ;;  %v654_v35 = vshll.u32 %v4066_v27, 16  ;;  %v4093_v45 = vld [vmem:[%s4024_s25 + $0x54] sm:$0xff]   ;;  %v4099_v49 = vld [vmem:[%s4024_s25 + $0x48] sm:$0xff]  }
  0x1c   : > { %787 = vrot.lane.b32.xlu1 %v4061_v23, %s3964_s27  ;;  %v602_v28 = vsel %vm590_vm0, %v597_v20, %v601_v16  ;;  %v613_v36 = vrot.slane %v611_v30, 1  ;;  %v4082_v38 = vsel %vm590_vm0, %v633_v31, %v637_v29  ;;  %v659_v41 = vshll.u32 %v4074_v33, 16  ;;  %v4088_v42 = vld [vmem:[%s4024_s25 + $0x38] ss:$0 sps:$4 sm:$0x11]   ;;  %v4118_v61 = vld [vmem:[%s4024_s25 + $0x6c] sm:$0xff]  }
  0x1d   : > { %783 = vrot.lane.b32.xlu0 %v602_v28, %s3964_s27  ;;  %v609_v39 = vor.u32 %v608_v32, %v604_v25  ;;  %v656_v40 = vrot.slane %v654_v35, 1  ;;  %5882 = vst [vmem:[#allocation5_spill] sm:$0xff] %v4088_v42  ;;  %v640_v43 = vshrl.u32 %v4079_v37, 16  ;;  %v642_v44 = vshll.u32 %v4079_v37, 16  ;;  %v4139_v20 = vld [vmem:[%s4024_s25 + $0x60] sm:$0xff]  }
  0x1e   : > { %v661_v48 = vrot.slane %v659_v41, 1  ;;  %v647_v51 = vshll.u32 %v4088_v42, 16  ;;  %v4105_v52 = vld [vmem:[%s4024_s25 + $0x5c] ss:$0 sps:$4 sm:$0x11]   ;;  %v676_v53 = vshrl.u32 %v4093_v45, 16 }
  0x1f   : > { %v4096_v46 = vsel %vm590_vm0, %v609_v39, %v613_v36  ;;  %v657_v47 = vor.u32 %v656_v40, %v652_v34  ;;  %v644_v50 = vrot.slane %v642_v44, 1  ;;  %v678_v55 = vshll.u32 %v4093_v45, 16  ;;  %v4121_v63 = vld [vmem:[%s4024_s25 + $0x50] ss:$0 sps:$4 sm:$0x11]   ;;  %v4147_v24 = vld [vmem:[%s4024_s25 + $0x84] sm:$0xff]  }
  0x20   : > { %789 = vrot.lane.b32.xlu1 %v4082_v38, %s3964_s27  ;;  %v664_v56 = vshrl.u32 %v4099_v49, 16  ;;  %v649_v58 = vrot.slane %v647_v51, 1  ;;  %v683_v59 = vshll.u32 %v4105_v52, 16  ;;  %v666_v60 = vshll.u32 %v4099_v49, 16  ;;  %5883 = vst [vmem:[#allocation6_spill] sm:$0xff] %v4121_v63  ;;  %v4166_v39 = vld [vmem:[%s4024_s25 + $0x78] sm:$0xff]  }
  0x21   : > { %785 = vrot.lane.b32.xlu0 %v4096_v46, %s3964_s27  ;;  %v4109_v54 = vsel %vm590_vm0, %v657_v47, %v661_v48  ;;  %v645_v57 = vor.u32 %v644_v50, %v640_v43  ;;  %v680_v62 = vrot.slane %v678_v55, 1  ;;  %v671_v8 = vshll.u32 %v4121_v63, 16  ;;  %v4130_v9 = vld [vmem:[%s4024_s25 + $0x74] ss:$0 sps:$4 sm:$0x11]   ;;  %v4177_v51 = vld [vmem:[%s4024_s25 + $0x9c] sm:$0xff]  }
  0x22   : > { %v685_v4 = vrot.slane %v683_v59, 1  ;;  %v668_v5 = vrot.slane %v666_v60, 1  ;;  %v700_v10 = vshrl.u32 %v4118_v61, 16  ;;  %v702_v11 = vshll.u32 %v4118_v61, 16 }
  0x23   : > { %v4124_v3 = vsel %vm590_vm0, %v645_v57, %v649_v58  ;;  %v681_v7 = vor.u32 %v680_v62, %v676_v53  ;;  %v673_v16 = vrot.slane %v671_v8, 1  ;;  %v707_v18 = vshll.u32 %v4130_v9, 16  ;;  %v4144_v21 = vld [vmem:[%s4024_s25 + $0x68] ss:$0 sps:$4 sm:$0x11]  }
  0x24   : > { %793 = vrot.lane.b32.xlu1 %v4109_v54, %s3964_s27  ;;  %v669_v13 = vor.u32 %v668_v5, %v664_v56  ;;  %v704_v17 = vrot.slane %v702_v11, 1  ;;  %v688_v29 = vshrl.u32 %v4139_v20, 16  ;;  %v690_v30 = vshll.u32 %v4139_v20, 16  ;;  %v4158_v32 = vld [vmem:[%s4024_s25 + $0x8c] ss:$0 sps:$4 sm:$0x11]  }
  0x25   : > { %791 = vrot.lane.b32.xlu0 %v4124_v3, %s3964_s27  ;;  %v4135_v15 = vsel %vm590_vm0, %v681_v7, %v685_v4  ;;  %v709_v28 = vrot.slane %v707_v18, 1  ;;  %v695_v31 = vshll.u32 %v4144_v21, 16  ;;  %v724_v34 = vshrl.u32 %v4147_v24, 16  ;;  %v4172_v44 = vld [vmem:[%s4024_s25 + $0x80] ss:$0 sps:$4 sm:$0x11]  }
  0x26   : > { %v4150_v25 = vsel %vm590_vm0, %v669_v13, %v673_v16  ;;  %v705_v26 = vor.u32 %v704_v17, %v700_v10  ;;  %v726_v36 = vshll.u32 %v4147_v24, 16  ;;  %v692_v40 = vrot.slane %v690_v30, 1  ;;  %v4181_v59 = vld [vmem:[%s4024_s25 + $0xa4] ss:$0 sps:$4 sm:$0x11]   ;;  %v4189_v7 = vld [vmem:[%s4024_s25 + $0x90] sm:$0xff]  }
  0x27   : > { %v697_v41 = vrot.slane %v695_v31, 1  ;;  %v731_v43 = vshll.u32 %v4158_v32, 16  ;;  %v712_v48 = vshrl.u32 %v4166_v39, 16  ;;  %v714_v50 = vshll.u32 %v4166_v39, 16  ;;  %v4211_v31 = vld [vmem:[%s4024_s25 + $0xa8] sm:$0xff]  }
  0x28   : > { %797 = vrot.lane.b32.xlu1 %v4135_v15, %s3964_s27  ;;  %v4162_v35 = vsel %vm590_vm0, %v705_v26, %v709_v28  ;;  %v728_v47 = vrot.slane %v726_v36, 1  ;;  %v693_v53 = vor.u32 %v692_v40, %v688_v29  ;;  %v719_v56 = vshll.u32 %v4172_v44, 16  ;;  %v4200_v16 = vld [vmem:[%s4024_s25 + $0x98] ss:$0 sps:$4 sm:$0x11]  }
  0x29   : > { %795 = vrot.lane.b32.xlu0 %v4150_v25, %s3964_s27  ;;  %v733_v55 = vrot.slane %v731_v43, 1  ;;  %v716_v58 = vrot.slane %v714_v50, 1  ;;  %v748_v60 = vshrl.u32 %v4177_v51, 16  ;;  %v750_v62 = vshll.u32 %v4177_v51, 16  ;;  %v4205_v26 = vld [vmem:[%s4024_s25 + $0xb4] sm:$0xff]  }
  0x2a   : > { %v729_v57 = vor.u32 %v728_v47, %v724_v34  ;;  %v4186_v4 = vsel %vm590_vm0, %v693_v53, %v697_v41  ;;  %v721_v5 = vrot.slane %v719_v56, 1  ;;  %v755_v13 = vshll.u32 %v4181_v59, 16  ;;  %v4215_v40 = vld [vmem:[%s4024_s25 + $0xbc] ss:$0 sps:$4 sm:$0x11]  }
  0x2b   : > { %v717_v10 = vor.u32 %v716_v58, %v712_v48  ;;  %v752_v11 = vrot.slane %v750_v62, 1  ;;  %v736_v17 = vshrl.u32 %v4189_v7, 16  ;;  %v738_v18 = vshll.u32 %v4189_v7, 16  ;;  %5884 = vst [vmem:[#allocation7_spill] sm:$0xff] %v4215_v40 }
  0x2c   : > { %801 = vrot.lane.b32.xlu1 %v4162_v35, %s3964_s27  ;;  %v4194_v8 = vsel %vm590_vm0, %v729_v57, %v733_v55  ;;  %v757_v30 = vrot.slane %v755_v13, 1  ;;  %v743_v36 = vshll.u32 %v4200_v16, 16  ;;  %v772_v41 = vshrl.u32 %v4205_v26, 16  ;;  %v4237_v58 = vld [vmem:[%s4024_s25 + $0xb0] ss:$0 sps:$4 sm:$0x11]  }
  0x2d   : > { %799 = vrot.lane.b32.xlu0 %v4186_v4, %s3964_s27  ;;  %v4208_v28 = vsel %vm590_vm0, %v717_v10, %v721_v5  ;;  %v753_v29 = vor.u32 %v752_v11, %v748_v60  ;;  %v740_v34 = vrot.slane %v738_v18, 1  ;;  %v774_v47 = vshll.u32 %v4205_v26, 16  ;;  %5885 = vst [vmem:[#allocation8_spill] sm:$0xff] %v4237_v58 }
  0x2e   : > { %v760_v48 = vshrl.u32 %v4211_v31, 16  ;;  %v745_v53 = vrot.slane %v743_v36, 1  ;;  %v779_v55 = vshll.u32 %v4215_v40, 16  ;;  %v762_v56 = vshll.u32 %v4211_v31, 16 }
  0x2f   : > { %v4221_v43 = vsel %vm590_vm0, %v753_v29, %v757_v30  ;;  %v741_v50 = vor.u32 %v740_v34, %v736_v17  ;;  %v776_v57 = vrot.slane %v774_v47, 1  ;;  %v767_v11 = vshll.u32 %v4237_v58, 16  ;;  %v3930_v30 = vld [vmem:[%s5854_s0] sm:$0xff]   ;;  %v4299_v36 = vld [vmem:[%s4234_s30 + $0x8] ss:$0 sps:$4 sm:$0x11]  }
  0x30   : > { %805 = vrot.lane.b32.xlu1 %v4194_v8, %s3964_s27  ;;  %v781_v62 = vrot.slane %v779_v55, 1  ;;  %v764_v5 = vrot.slane %v762_v56, 1  ;;  %3582 = vmatprep.subr.bf16.mxu0 %v3930_v30  ;;  %v4276_v34 = vld [vmem:[%s4234_s30] sm:$0xff]   ;;  %5887 = vst [vmem:[#allocation10_spill] sm:$0xff] %v4299_v36  ;;  %v4356_v56 = vld [vmem:[%s5854_s0 + $0x10] sm:$0xff]  }
  0x31   : > { %803 = vrot.lane.b32.xlu0 %v4208_v28, %s3964_s27  ;;  %v746_v60 = vsel %vm590_vm0, %v741_v50, %v745_v53  ;;  %v777_v10 = vor.u32 %v776_v57, %v772_v41  ;;  %v769_v18 = vrot.slane %v767_v11, 1  ;;  %3583 = vmatpush3.bf16.msra.mxu0 %v3930_v30  ;;  %5886 = vst [vmem:[#allocation9_spill] sm:$0xff] %v4276_v34  ;;  %v5863_v41 = vshrl.u32 %v4200_v16, 16 }
  0x32   : > { %v765_v13 = vor.u32 %v764_v5, %v760_v48  ;;  %v5862_v50 = vshrl.u32 %v4181_v59, 16  ;;  %v1449_v53 = vshrl.u32 %v4030_v1, 16  ;;  %v5861_v57 = vshrl.u32 %v4237_v58, 16  ;;  %3650 = vmatprep.subr.bf16.mxu0 %v4356_v56 }
  0x33   : > { %v782_v17 = vsel %vm590_vm0, %v777_v10, %v781_v62  ;;  %v1451_v10 = vshrl.u32 %v4049_v14, 16  ;;  %v5860_v11 = vshrl.u32 %v4215_v40, 16 }
  0x34   : > { %809 = vrot.lane.b32.xlu1 %v4221_v43, %s3964_s27  ;;  %v770_v29 = vsel %vm590_vm0, %v765_v13, %v769_v18  ;;  %v4387_v18 = vld [vmem:[%s387_s17 + $0x8] ss:$0 sps:$4 sm:$0x11]  }
  0x35   : > { %807 = vrot.lane.b32.xlu0 %v746_v60, %s3964_s27  ;;  %5889 = vst [vmem:[#allocation12_spill] sm:$0xff] %v4387_v18 }
  0x38   : > { %813 = vrot.lane.b32.xlu1 %v782_v17, %s3964_s27 }
  0x39   : > { %811 = vrot.lane.b32.xlu0 %v770_v29, %s3964_s27 }
  0x3c   : > { %822 = vrot.lane.b32.xlu1 %v4027_v0, %s3965_s6 }
  0x3d   : > { %820 = vrot.lane.b32.xlu0 %v4054_v19, %s3965_s6 }
  0x40   : > { %826 = vrot.lane.b32.xlu1 %v4079_v37, %s3965_s6 }
  0x41   : > { %824 = vrot.lane.b32.xlu0 %v4046_v12, %s3965_s6 }
  0x44   : > { %830 = vrot.lane.b32.xlu1 %v4099_v49, %s3965_s6 }
  0x45   : > { %828 = vrot.lane.b32.xlu0 %v4066_v27, %s3965_s6 }
  0x48   : > { %834 = vrot.lane.b32.xlu1 %v4139_v20, %s3965_s6 }
  0x49   : > { %832 = vrot.lane.b32.xlu0 %v4093_v45, %s3965_s6 }
  0x4c   : > { %838 = vrot.lane.b32.xlu1 %v4166_v39, %s3965_s6 }
  0x4d   : > { %836 = vrot.lane.b32.xlu0 %v4118_v61, %s3965_s6 }
  0x50   : > { %842 = vrot.lane.b32.xlu1 %v4189_v7, %s3965_s6 }
  0x51   : > { %840 = vrot.lane.b32.xlu0 %v4147_v24, %s3965_s6 }
  0x54   : > { %846 = vrot.lane.b32.xlu1 %v4211_v31, %s3965_s6 }
  0x55   : > { %844 = vrot.lane.b32.xlu0 %v4177_v51, %s3965_s6 }
  0x58   : > { %850 = vrot.lane.b32.xlu1 %v4276_v34, %s3965_s6 }
  0x59   : > { %848 = vrot.lane.b32.xlu0 %v4205_v26, %s3965_s6 }
  0x5c   : > { %869 = vrot.lane.b32.xlu1 %v4061_v23, %s3966_s9  ;;  %v858_v23 = vshll.u32 %v4276_v34, 16 }
  0x5d   : > { %867 = vrot.lane.b32.xlu0 %v4096_v46, %s3966_s9 }
  0x5e   : > { %v860_v46 = vrot.slane %v858_v23, 1 }
  0x60   : > { %873 = vrot.lane.b32.xlu1 %v4124_v3, %s3966_s9  ;;  %v863_v3 = vshll.u32 %v4299_v36, 16 }
  0x61   : > { %871 = vrot.lane.b32.xlu0 %v4082_v38, %s3966_s9  ;;  %v856_v38 = vshrl.u32 %v4276_v34, 16 }
  0x64   : > { %877 = vrot.lane.b32.xlu1 %v4150_v25, %s3966_s9  ;;  %v865_v25 = vrot.slane %v863_v3, 1  ;;  %v2315_v3 = vshll.u32 %v4387_v18, 16 }
  0x65   : > { %875 = vrot.lane.b32.xlu0 %v4109_v54, %s3966_s9  ;;  %v861_v54 = vor.u32 %v860_v46, %v856_v38 }
  0x68   : > { %881 = vrot.lane.b32.xlu1 %v4186_v4, %s3966_s9  ;;  %v1445_v4 = vshrl.u32 %v4040_v6, 16 }
  0x69   : > { %879 = vrot.lane.b32.xlu0 %v4135_v15, %s3966_s9  ;;  %v866_v15 = vsel %vm590_vm0, %v861_v54, %v865_v25  ;;  %v2317_v25 = vrot.slane %v2315_v3, 1 }
  0x6c   : > { %885 = vrot.lane.b32.xlu1 %v4208_v28, %s3966_s9  ;;  %v1447_v28 = vshrl.u32 %v4058_v22, 16 }
  0x6d   : > { %883 = vrot.lane.b32.xlu0 %v4162_v35, %s3966_s9  ;;  %v5865_v35 = vshrl.u32 %v4144_v21, 16 }
  0x70   : > { %889 = vrot.lane.b32.xlu1 %v746_v60, %s3966_s9 }
  0x71   : > { %887 = vrot.lane.b32.xlu0 %v4194_v8, %s3966_s9  ;;  %v5864_v8 = vshrl.u32 %v4158_v32, 16 }
  0x74   : > { %893 = vrot.lane.b32.xlu1 %v770_v29, %s3966_s9 }
  0x75   : > { %891 = vrot.lane.b32.xlu0 %v4221_v43, %s3966_s9  ;;  %v3931_v43 = vld [vmem:[%s5854_s0 + $0x8] sm:$0xff]  }
  0x76   : > { %3616 = vmatprep.subr.bf16.mxu1 %v3931_v43 }
  0x77   : > { %3617 = vmatpush3.bf16.msra.mxu1 %v3931_v43 }
  0x78   : > { %897 = vrot.lane.b32.xlu1 %v866_v15, %s3966_s9 }
  0x79   : > { %895 = vrot.lane.b32.xlu0 %v782_v17, %s3966_s9  ;;  %v4384_v17 = vld [vmem:[%s387_s17] sm:$0xff]  }
  0x7a   : > { %5888 = vst [vmem:[#allocation11_spill] sm:$0xff] %v4384_v17  ;;  %v2310_v29 = vshll.u32 %v4384_v17, 16  ;;  %v2308_v38 = vshrl.u32 %v4384_v17, 16 }
  0x7c   : > { %1477 = vrot.lane.b32.xlu1 %v1445_v4, %s3964_s27  ;;  %v2312_v46 = vrot.slane %v2310_v29, 1 }
  0x7d   : > { %1557 = vrot.lane.b32.xlu0 %v5865_v35, %s3966_s9 }
  0x7e   : > { %v2313_v54 = vor.u32 %v2312_v46, %v2308_v38  ;;  %v1453_v38 = vshrl.u32 %v4088_v42, 16 }
  0x80   : > { %1479 = vrot.lane.b32.xlu1 %v1447_v28, %s3964_s27 }
  0x81   : > { %1563 = vrot.lane.b32.xlu0 %v5864_v8, %s3966_s9  ;;  %v1457_v8 = vshrl.u32 %v4121_v63, 16 }
  0x84   : > { %1509 = vrot.lane.b32.xlu1 %v4058_v22, %s3965_s6 }
  0x85   : > { %1501 = vrot.lane.b32.xlu0 %v5863_v41, %s3964_s27 }
  0x88   : > { %1511 = vrot.lane.b32.xlu1 %v4030_v1, %s3965_s6 }
  0x89   : > { %1533 = vrot.lane.b32.xlu0 %v4181_v59, %s3965_s6 }
  0x8c   : > { %1543 = vrot.lane.b32.xlu1 %v1447_v28, %s3966_s9  ;;  %v2318_v28 = vsel %vm590_vm0, %v2313_v54, %v2317_v25  ;;  %v1455_v54 = vshrl.u32 %v4074_v33, 16 }
  0x8d   : > { %1567 = vrot.lane.b32.xlu0 %v5862_v50, %s3966_s9 }
  0x8e   : > { %v4342_v47 = vpop.permute.xlu1 %787 }
  0x8f   : > { %v4344_v48 = vpop.permute.xlu0 %783 }
  0x90   : > { %1545 = vrot.lane.b32.xlu1 %v1449_v53, %s3966_s9 }
  0x91   : > { %1505 = vrot.lane.b32.xlu0 %v5861_v57, %s3964_s27 }
  0x92   : > { %v4351_v55 = vpop.permute.xlu1 %789 }
  0x93   : > { %v4362_v60 = vpop.permute.xlu0 %785 }
  0x94   : > { %1481 = vrot.lane.b32.xlu1 %v1449_v53, %s3964_s27  ;;  %v903_v1 = vsel %vm899_vm1, %v4054_v19, %v4362_v60 }
  0x95   : > { %1537 = vrot.lane.b32.xlu0 %v4215_v40, %s3965_s6 }
  0x96   : > { %v4366_v62 = vpop.permute.xlu1 %793 }
  0x97   : > { %v4371_v5 = vpop.permute.xlu0 %791 }
  0x98   : > { %1483 = vrot.lane.b32.xlu1 %v1451_v10, %s3964_s27 }
  0x99   : > { %1571 = vrot.lane.b32.xlu0 %v5860_v11, %s3966_s9 }
  0x9a   : > { %v4382_v13 = vpop.permute.xlu1 %797 }
  0x9b   : > { %v4390_v30 = vpop.permute.xlu0 %795 }
  0x9c   : > { %1513 = vrot.lane.b32.xlu1 %v4049_v14, %s3965_s6 }
  0x9d   : > { %2295 = vrot.lane.b32.xlu0 %v866_v15, %s3964_s27 }
  0x9e   : > { %v4395_v23 = vpop.permute.xlu1 %801 }
  0x9f   : > { %v4402_v4 = vpop.permute.xlu0 %799 }
  0xa0   : > { %1515 = vrot.lane.b32.xlu1 %v4088_v42, %s3965_s6 }
  0xa1   : > { %2319 = vrot.lane.b32.xlu0 %v2318_v28, %s3966_s9 }
  0xa2   : > { %v4407_v43 = vpop.permute.xlu1 %805 }
  0xa3   : > { %v4410_v53 = vpop.permute.xlu0 %803 }
  0xa4   : > { %1547 = vrot.lane.b32.xlu1 %v1451_v10, %s3966_s9 }
  0xa5   : > { %2747 = vrot.lane.b32.xlu0 %v4387_v18, %s3965_s6  ;;  %v1459_v18 = vshrl.u32 %v4105_v52, 16 }
  0xa6   : > { %v4413_v29 = vpop.permute.xlu1 %809 }
  0xa7   : > { %v4418_v15 = vpop.permute.xlu0 %807 }
  0xa8   : > { %1549 = vrot.lane.b32.xlu1 %v1453_v38, %s3966_s9 }
  0xaa   : > { %v4421_v46 = vpop.permute.xlu1 %813 }
  0xab   : > { %v4423_v3 = vpop.permute.xlu0 %811 }
  0xac   : > { %1485 = vrot.lane.b32.xlu1 %v1453_v38, %s3964_s27 }
  0xae   : > { %v823_v10 = vpop.permute.xlu1 %822 }
  0xaf   : > { %v821_v25 = vpop.permute.xlu0 %820 }
  0xb0   : > { %1487 = vrot.lane.b32.xlu1 %v1455_v54, %s3964_s27 }
  0xb2   : > { %v827_v28 = vpop.permute.xlu1 %826 }
  0xb3   : > { %v825_v11 = vpop.permute.xlu0 %824 }
  0xb4   : > { %1517 = vrot.lane.b32.xlu1 %v4074_v33, %s3965_s6 }
  0xb6   : > { %v4430_v57 = vpop.permute.xlu1 %830 }
  0xb7   : > { %v829_v50 = vpop.permute.xlu0 %828 }
  0xb8   : > { %1519 = vrot.lane.b32.xlu1 %v4121_v63, %s3965_s6  ;;  %v901_v63 = vsel %vm899_vm1, %v4033_v2, %v4344_v48 }
  0xb9   : > { %v934_v36 = vsel %vm932_vm2, %v901_v63, %v821_v25  ;;  %v905_v63 = vsel %vm899_vm1, %v4027_v0, %v4342_v47  ;;  %v907_v47 = vsel %vm899_vm1, %v4046_v12, %v4351_v55  ;;  %v913_v12 = vsel %vm899_vm1, %v4099_v49, %v4390_v30 }
  0xba   : > { %v4434_v41 = vpop.permute.xlu1 %834 }
  0xbb   : > { %v833_v38 = vpop.permute.xlu0 %832 }
  0xbc   : > { %1551 = vrot.lane.b32.xlu1 %v1455_v54, %s3966_s9  ;;  %v946_v55 = vsel %vm932_vm2, %v913_v12, %v833_v38  ;;  %v917_v38 = vsel %vm899_vm1, %v4139_v20, %v4402_v4  ;;  %v1465_v20 = vshrl.u32 %v4172_v44, 16 }
  0xbe   : > { %v4438_v35 = vpop.permute.xlu1 %838 }
  0xbf   : > { %v4440_v34 = vpop.permute.xlu0 %836 }
  0xc0   : > { %1553 = vrot.lane.b32.xlu1 %v1457_v8, %s3966_s9 }
  0xc2   : > { %v4443_v33 = vpop.permute.xlu1 %842 }
  0xc3   : > { %v4445_v42 = vpop.permute.xlu0 %840 }
  0xc4   : > { %1489 = vrot.lane.b32.xlu1 %v1457_v8, %s3964_s27 }
  0xc6   : > { %v4449_v17 = vpop.permute.xlu1 %846 }
  0xc7   : > { %v4451_v14 = vpop.permute.xlu0 %844 }
  0xc8   : > { %1491 = vrot.lane.b32.xlu1 %v1459_v18, %s3964_s27 }
  0xca   : > { %v4454_v54 = vpop.permute.xlu1 %850 }
  0xcb   : > { %5890 = vst [vmem:[#allocation13_spill] sm:$0xff] %v4454_v54  ;;  %v4462_v8 = vpop.permute.xlu0 %848  ;;  %v936_v54 = vsel %vm932_vm2, %v903_v1, %v823_v10  ;;  %v909_v1 = vsel %vm899_vm1, %v4079_v37, %v4371_v5  ;;  %v4498_v37 = vld [vmem:[%s5854_s0 + $0x18] sm:$0xff]  }
  0xcc   : > { %1521 = vrot.lane.b32.xlu1 %v4105_v52, %s3965_s6  ;;  %v942_v10 = vsel %vm932_vm2, %v909_v1, %v829_v50  ;;  %v1463_v50 = vshrl.u32 %v4130_v9, 16  ;;  %3684 = vmatprep.subr.bf16.mxu1 %v4498_v37 }
  0xce   : > { %v870_v40 = vpop.permute.xlu1 %869 }
  0xcf   : > { %v4469_v58 = vsel %vm965_vm3, %v936_v54, %v870_v40  ;;  %v868_v2 = vpop.permute.xlu0 %867  ;;  %v938_v40 = vsel %vm932_vm2, %v905_v63, %v825_v11  ;;  %v940_v11 = vsel %vm932_vm2, %v907_v47, %v827_v28 }
  0xd0   : > { %1523 = vrot.lane.b32.xlu1 %v4144_v21, %s3965_s6  ;;  %v4474_v19 = vsel %vm965_vm3, %v934_v36, %v868_v2  ;;  %v911_v2 = vsel %vm899_vm1, %v4066_v27, %v4366_v62  ;;  %v950_v27 = vsel %vm932_vm2, %v917_v38, %v4440_v34  ;;  %v915_v62 = vsel %vm899_vm1, %v4093_v45, %v4382_v13 }
  0xd1   : > { %3584 = vmatprep.mubr.msk.bf16.mxu0 %vm1006_vm4, %v4474_v19  ;;  %v944_v49 = vsel %vm932_vm2, %v911_v2, %v4430_v57  ;;  %v948_v4 = vsel %vm932_vm2, %v915_v62, %v4434_v41  ;;  %v921_v45 = vsel %vm899_vm1, %v4166_v39, %v4410_v53 }
  0xd2   : > { %v874_v48 = vpop.permute.xlu1 %873  ;;  %3585 = vmatmul.mubr.msk.bf16.vlgmr.msra.gmra.mrb[0].mxu0 %vm1006_vm4, %v4469_v58  ;;  %v954_v41 = vsel %vm932_vm2, %v921_v45, %v4445_v42  ;;  %v925_v42 = vsel %vm899_vm1, %v4189_v7, %v4418_v15 }
  0xd3   : > { %v872_v60 = vpop.permute.xlu0 %871  ;;  %3651 = vmatpush3.bf16.msra.mxu0 %v4356_v56  ;;  %v5891_v56 = vshrl.u32 %v4144_v21, 16  ;;  %v4513_v25 = vsel %vm965_vm3, %v940_v11, %v874_v48 }
  0xd4   : > { %1555 = vrot.lane.b32.xlu1 %v1459_v18, %s3966_s9  ;;  %v4490_v36 = vsel %vm965_vm3, %v938_v40, %v872_v60 }
  0xd5   : > { %3588 = vmatprep.mubr.msk.bf16.mxu0 %vm1006_vm4, %v4490_v36 }
  0xd6   : > { %v878_v0 = vpop.permute.xlu1 %877 }
  0xd7   : > { %v876_v5 = vpop.permute.xlu0 %875  ;;  %v4535_v63 = vsel %vm965_vm3, %v944_v49, %v878_v0  ;;  %v919_v0 = vsel %vm899_vm1, %v4118_v61, %v4395_v23  ;;  %v5892_v61 = vshrl.u32 %v4158_v32, 16 }
  0xd8   : > { %1493 = vrot.lane.b32.xlu1 %v5891_v56, %s3964_s27  ;;  %v4509_v18 = vsel %vm965_vm3, %v942_v10, %v876_v5  ;;  %v952_v39 = vsel %vm932_vm2, %v919_v0, %v4438_v35  ;;  %v958_v35 = vsel %vm932_vm2, %v925_v42, %v4451_v14 }
  0xda   : > { %v882_v54 = vpop.permute.xlu1 %881  ;;  %3589 = vmatmul.mubr.msk.bf16.gmra.mrb[4].mxu0 %vm1006_vm4, %v4513_v25 }
  0xdb   : > { %3592 = vmatprep.mubr.msk.bf16.mxu0 %vm1006_vm4, %v4509_v18  ;;  %v880_v48 = vpop.permute.xlu0 %879  ;;  %v4559_v10 = vsel %vm965_vm3, %v948_v4, %v882_v54  ;;  %v1673_v54 = vshll.u32 %v4474_v19, 16  ;;  %v1681_v4 = vshrl.u32 %v4469_v58, 16 }
  0xdc   : > { %1495 = vrot.lane.b32.xlu1 %v1463_v50, %s3964_s27  ;;  %v4532_v30 = vsel %vm965_vm3, %v946_v55, %v880_v48  ;;  %v1671_v55 = vshrl.u32 %v4474_v19, 16  ;;  %v927_v48 = vsel %vm899_vm1, %v4177_v51, %v4413_v29 }
  0xde   : > { %v886_v28 = vpop.permute.xlu1 %885 }
  0xdf   : > { %v884_v40 = vpop.permute.xlu0 %883  ;;  %v4583_v5 = vsel %vm965_vm3, %v952_v39, %v886_v28  ;;  %v5895_v39 = vld [vmem:[#allocation8_spill] sm:$0xff] }
  0xe0   : > { %1525 = vrot.lane.b32.xlu1 %v4130_v9, %s3965_s6  ;;  %v4556_v60 = vsel %vm965_vm3, %v950_v27, %v884_v40 }
  0xe2   : > { %v890_v1 = vpop.permute.xlu1 %889  ;;  %3593 = vmatmul.mubr.msk.bf16.gmra.mrb[8].mxu0 %vm1006_vm4, %v4535_v63 }
  0xe3   : > { %3596 = vmatprep.mubr.msk.bf16.mxu0 %vm1006_vm4, %v4532_v30  ;;  %v888_v47 = vpop.permute.xlu0 %887 }
  0xe4   : > { %1527 = vrot.lane.b32.xlu1 %v4172_v44, %s3965_s6  ;;  %v4580_v53 = vsel %vm965_vm3, %v954_v41, %v888_v47  ;;  %v5894_v41 = vshrl.u32 %v4181_v59, 16  ;;  %v931_v47 = vsel %vm899_vm1, %v4205_v26, %v4421_v46  ;;  %v5897_v26 = vshrl.u32 %v5895_v39, 16 }
  0xe6   : > { %v894_v57 = vpop.permute.xlu1 %893 }
  0xe7   : > { %v892_v11 = vpop.permute.xlu0 %891 }
  0xe8   : > { %1559 = vrot.lane.b32.xlu1 %v1463_v50, %s3966_s9  ;;  %v923_v50 = vsel %vm899_vm1, %v4147_v24, %v4407_v43  ;;  %v4605_v15 = vsel %vm965_vm3, %v958_v35, %v892_v11  ;;  %v929_v24 = vsel %vm899_vm1, %v4211_v31, %v4423_v3  ;;  %v1675_v31 = vrot.slane %v1673_v54, 1 }
  0xe9   : > { %v956_v7 = vsel %vm932_vm2, %v923_v50, %v4443_v33  ;;  %v1683_v33 = vshll.u32 %v4469_v58, 16  ;;  %v962_v43 = vsel %vm932_vm2, %v929_v24, %v4462_v8  ;;  %v960_v8 = vsel %vm932_vm2, %v927_v48, %v4449_v17 }
  0xea   : > { %v4561_v34 = vpop.permute.xlu1 %897  ;;  %3597 = vmatmul.mubr.msk.bf16.gmra.mrb[12].mxu0 %vm1006_vm4, %v4559_v10  ;;  %v4609_v12 = vsel %vm965_vm3, %v956_v7, %v890_v1  ;;  %v4642_v62 = vsel %vm965_vm3, %v960_v8, %v894_v57  ;;  %v5901_v7 = vld [vmem:[#allocation2_spill] sm:$0xff] }
  0xeb   : > { %3600 = vmatprep.mubr.msk.bf16.mxu0 %vm1006_vm4, %v4556_v60  ;;  %v896_v49 = vpop.permute.xlu0 %895  ;;  %v1685_v19 = vrot.slane %v1683_v33, 1 }
  0xec   : > { %1561 = vrot.lane.b32.xlu1 %v1465_v20, %s3966_s9  ;;  %v4637_v38 = vsel %vm965_vm3, %v962_v43, %v896_v49 }
  0xed   : > { %v1686_v57 = vor.u32 %v1685_v19, %v1681_v4  ;;  %v1701_v19 = vshrl.u32 %v4513_v25, 16 }
  0xee   : > { %v1478_v13 = vpop.permute.xlu1 %1477 }
  0xf0   : > { %1497 = vrot.lane.b32.xlu1 %v1465_v20, %s3964_s27  ;;  %v1676_v20 = vor.u32 %v1675_v31, %v1671_v55  ;;  %v1691_v55 = vshrl.u32 %v4490_v36, 16 }
  0xf2   : > { %v1480_v56 = vpop.permute.xlu1 %1479  ;;  %3601 = vmatmul.mubr.msk.bf16.gmra.mrb[16].mxu0 %vm1006_vm4, %v4583_v5 }
  0xf3   : > { %3604 = vmatprep.mubr.msk.bf16.mxu0 %vm1006_vm4, %v4580_v53  ;;  %v1578_v27 = vsel %vm899_vm1, %v4058_v22, %v1480_v56  ;;  %v5896_v56 = vld [vmem:[#allocation13_spill] sm:$0xff] }
  0xf4   : > { %1499 = vrot.lane.b32.xlu1 %v5892_v61, %s3964_s27  ;;  %v964_v42 = vsel %vm932_vm2, %v931_v47, %v5896_v56  ;;  %v1723_v47 = vshll.u32 %v4535_v63, 16  ;;  %v1711_v56 = vshrl.u32 %v4509_v18, 16 }
  0xf5   : > { %v4670_v61 = vsel %vm965_vm3, %v964_v42, %v4561_v34  ;;  %v1693_v34 = vshll.u32 %v4490_v36, 16 }
  0xf6   : > { %v1510_v23 = vpop.permute.xlu1 %1509 }
  0xf7   : > { %v1695_v24 = vrot.slane %v1693_v34, 1 }
  0xf8   : > { %1529 = vrot.lane.b32.xlu1 %v4158_v32, %s3965_s6  ;;  %v1576_v32 = vsel %vm899_vm1, %v4040_v6, %v1478_v13  ;;  %v5893_v6 = vshrl.u32 %v4200_v16, 16 }
  0xf9   : > { %v1608_v3 = vsel %vm932_vm2, %v1576_v32, %v1510_v23  ;;  %v5898_v23 = vld [vmem:[#allocation7_spill] sm:$0xff]  ;;  %v1696_v48 = vor.u32 %v1695_v24, %v1691_v55 }
  0xfa   : > { %v1512_v14 = vpop.permute.xlu1 %1511  ;;  %3605 = vmatmul.mubr.msk.bf16.gmra.mrb[20].mxu0 %vm1006_vm4, %v4609_v12  ;;  %v5899_v50 = vshrl.u32 %v5898_v23, 16 }
  0xfb   : > { %3608 = vmatprep.mubr.msk.bf16.mxu0 %vm1006_vm4, %v4605_v15  ;;  %v1610_v51 = vsel %vm932_vm2, %v1578_v27, %v1512_v14  ;;  %v1703_v14 = vshll.u32 %v4513_v25, 16  ;;  %v5903_v27 = vld [vmem:[#allocation11_spill] sm:$0xff] }
  0xfc   : > { %1531 = vrot.lane.b32.xlu1 %v4200_v16, %s3965_s6 }
  0xfe   : > { %v1544_v28 = vpop.permute.xlu1 %1543 }
  0xff   : > { %v1640_v2 = vsel %vm965_vm3, %v1608_v3, %v1544_v28  ;;  %v5902_v3 = vld [vmem:[#allocation3_spill] sm:$0xff] }
 0x100   : > { %v1677_v1 = vshll.u32 %v1640_v2, 16  ;;  %1565 = vrot.lane.b32.xlu1 %v5893_v6, %s3966_s9  ;;  %v1705_v2 = vrot.slane %v1703_v14, 1  ;;  %v1721_v14 = vshrl.u32 %v4535_v63, 16 }
 0x102   : > { %v1679_v29 = vrot.slane %v1677_v1, 1  ;;  %v1546_v40 = vpop.permute.xlu1 %1545  ;;  %3609 = vmatmul.mubr.msk.bf16.gmra.mrb[24].mxu0 %vm1006_vm4, %v4642_v62 }
 0x103   : > { %v1642_v17 = vsel %vm965_vm3, %v1610_v51, %v1546_v40  ;;  %3612 = vmatprep.mubr.msk.bf16.mxu0 %vm1006_vm4, %v4637_v38 }
 0x104   : > { %v1687_v45 = vshll.u32 %v1642_v17, 16  ;;  %1503 = vrot.lane.b32.xlu1 %v5894_v41, %s3964_s27  ;;  %v1680_v22 = vsel %vm590_vm0, %v1676_v20, %v1679_v29  ;;  %v1706_v29 = vor.u32 %v1705_v2, %v1701_v19  ;;  %v5907_v19 = vld [vmem:[#allocation6_spill] sm:$0xff] }
 0x105   : > { %3618 = vmatprep.mubr.msk.bf16.mxu1 %vm1006_vm4, %v1680_v22  ;;  %v1713_v22 = vshll.u32 %v4509_v18, 16 }
 0x106   : > { %v1689_v13 = vrot.slane %v1687_v45, 1  ;;  %v1482_v0 = vpop.permute.xlu1 %1481 }
 0x107   : > { %v1580_v54 = vsel %vm899_vm1, %v5901_v7, %v1482_v0  ;;  %v1715_v42 = vrot.slane %v1713_v22, 1 }
 0x108   : > { %1535 = vrot.lane.b32.xlu1 %v5895_v39, %s3965_s6  ;;  %v4662_v59 = vsel %vm590_vm0, %v1686_v57, %v1689_v13  ;;  %v5905_v13 = vld [vmem:[#allocation5_spill] sm:$0xff] }
 0x109   : > { %3619 = vmatmul.mubr.msk.bf16.vlgmr.msra.gmra.mrb[0].mxu1 %vm1006_vm4, %v4662_v59 }
 0x10a   : > { %v1484_v35 = vpop.permute.xlu1 %1483  ;;  %3685 = vmatpush3.bf16.msra.mxu1 %v4498_v37  ;;  %3613 = vmatmul.mubr.msk.bf16.gmra.mrb[28].mxu0 %vm1006_vm4, %v4670_v61 }
 0x10b   : > { %3652 = vmatprep.mubr.msk.bf16.mxu0 %vm1006_vm4, %v4469_v58  ;;  %v5900_v58 = vld [vmem:[#allocation10_spill] sm:$0xff]  ;;  %v1582_v28 = vsel %vm899_vm1, %v5902_v3, %v1484_v35 }
 0x10c   : > { %1569 = vrot.lane.b32.xlu1 %v5897_v26, %s3966_s9  ;;  %v1541_v37 = vshrl.u32 %v5900_v58, 16 }
 0x10e   : > { %v1514_v46 = vpop.permute.xlu1 %1513 }
 0x10f   : > { %v1612_v33 = vsel %vm932_vm2, %v1580_v54, %v1514_v46 }
 0x110   : > { %1507 = vrot.lane.b32.xlu1 %v5899_v50, %s3964_s27  ;;  %v5906_v50 = vld [vmem:[#allocation4_spill] sm:$0xff] }
 0x112   : > { %v1516_v11 = vpop.permute.xlu1 %1515  ;;  %3653 = vmatmul.mubr.msk.bf16.vlgmr.msra.gmra.mrb[32].mxu0 %vm1006_vm4, %v4490_v36 }
 0x113   : > { %3656 = vmatprep.mubr.msk.bf16.mxu0 %vm1006_vm4, %v4513_v25  ;;  %v1614_v49 = vsel %vm932_vm2, %v1582_v28, %v1516_v11  ;;  %v5904_v25 = vld [vmem:[#allocation12_spill] sm:$0xff]  ;;  %v1725_v11 = vrot.slane %v1723_v47, 1  ;;  %v1733_v28 = vshll.u32 %v4532_v30, 16 }
 0x114   : > { %1539 = vrot.lane.b32.xlu1 %v5900_v58, %s3965_s6  ;;  %v2749_v4 = vshrl.u32 %v5904_v25, 16  ;;  %v1716_v58 = vor.u32 %v1715_v42, %v1711_v56 }
 0x116   : > { %v1548_v32 = vpop.permute.xlu1 %1547 }
 0x117   : > { %v1644_v43 = vsel %vm965_vm3, %v1612_v33, %v1548_v32  ;;  %v1726_v32 = vor.u32 %v1725_v11, %v1721_v14  ;;  %v1751_v11 = vshrl.u32 %v4556_v60, 16 }
 0x118   : > { %v1697_v31 = vshll.u32 %v1644_v43, 16  ;;  %1573 = vrot.lane.b32.xlu1 %v1541_v37, %s3966_s9 }
 0x11a   : > { %v1699_v1 = vrot.slane %v1697_v31, 1  ;;  %v1550_v6 = vpop.permute.xlu1 %1549  ;;  %3657 = vmatmul.mubr.msk.bf16.gmra.mrb[36].mxu0 %vm1006_vm4, %v4509_v18 }
 0x11b   : > { %v1646_v8 = vsel %vm965_vm3, %v1614_v49, %v1550_v6  ;;  %3660 = vmatprep.mubr.msk.bf16.mxu0 %vm1006_vm4, %v4535_v63  ;;  %v1743_v49 = vshll.u32 %v4559_v10, 16 }
 0x11c   : > { %v1707_v36 = vshll.u32 %v1646_v8, 16  ;;  %2302 = vrot.lane.b32.xlu1 %v5903_v27, %s3965_s6  ;;  %v4710_v51 = vsel %vm590_vm0, %v1696_v48, %v1699_v1  ;;  %v1558_v1 = vpop.permute.xlu0 %1557 }
 0x11d   : > { %3622 = vmatprep.mubr.msk.bf16.mxu1 %vm1006_vm4, %v4710_v51  ;;  %v1745_v25 = vrot.slane %v1743_v49, 1 }
 0x11e   : > { %v1709_v40 = vrot.slane %v1707_v36, 1  ;;  %v1486_v20 = vpop.permute.xlu1 %1485 }
 0x11f   : > { %v1584_v0 = vsel %vm899_vm1, %v5905_v13, %v1486_v20 }
 0x120   : > { %v4715_v17 = vsel %vm590_vm0, %v1706_v29, %v1709_v40  ;;  %2745 = vrot.lane.b32.xlu1 %v1541_v37, %s3964_s27  ;;  %v1735_v29 = vrot.slane %v1733_v28, 1  ;;  %s5508_s27 = scalar_lea.vmem %s5858_s4, %s3509_s24 }
 0x121   : > { %3623 = vmatmul.mubr.msk.bf16.gmra.mrb[4].mxu1 %vm1006_vm4, %v4715_v17 }
 0x122   : > { %v1488_v45 = vpop.permute.xlu1 %1487  ;;  %3661 = vmatmul.mubr.msk.bf16.gmra.mrb[40].mxu0 %vm1006_vm4, %v4532_v30 }
 0x123   : > { %3664 = vmatprep.mubr.msk.bf16.mxu0 %vm1006_vm4, %v4559_v10  ;;  %v1586_v34 = vsel %vm899_vm1, %v5906_v50, %v1488_v45 }
 0x124   : > { %2751 = vrot.lane.b32.xlu1 %v2749_v4, %s3966_s9 }
 0x126   : > { %v1518_v41 = vpop.permute.xlu1 %1517 }
 0x127   : > { %v1616_v35 = vsel %vm932_vm2, %v1584_v0, %v1518_v41  ;;  %v1741_v41 = vshrl.u32 %v4559_v10, 16  ;;  %v1564_v10 = vpop.permute.xlu0 %1563 }
 0x129   : > { %v1746_v47 = vor.u32 %v1745_v25, %v1741_v41 }
 0x12a   : > { %v1520_v57 = vpop.permute.xlu1 %1519  ;;  %3665 = vmatmul.mubr.msk.bf16.gmra.mrb[44].mxu0 %vm1006_vm4, %v4556_v60 }
 0x12b   : > { %3668 = vmatprep.mubr.msk.bf16.mxu0 %vm1006_vm4, %v4583_v5  ;;  %v1618_v37 = vsel %vm932_vm2, %v1586_v34, %v1520_v57  ;;  %v1763_v34 = vshll.u32 %v4583_v5, 16 }
 0x12e   : > { %v1552_v26 = vpop.permute.xlu1 %1551 }
 0x12f   : > { %v1648_v46 = vsel %vm965_vm3, %v1616_v35, %v1552_v26  ;;  %v1753_v26 = vshll.u32 %v4556_v60, 16  ;;  %v1761_v60 = vshrl.u32 %v4583_v5, 16  ;;  %v1773_v5 = vshll.u32 %v4580_v53, 16 }
 0x130   : > { %v1717_v23 = vshll.u32 %v1648_v46, 16 }
 0x132   : > { %v1719_v7 = vrot.slane %v1717_v23, 1  ;;  %v1554_v54 = vpop.permute.xlu1 %1553  ;;  %3669 = vmatmul.mubr.msk.bf16.gmra.mrb[48].mxu0 %vm1006_vm4, %v4580_v53  ;;  %v1502_v23 = vpop.permute.xlu0 %1501 }
 0x133   : > { %v1650_v18 = vsel %vm965_vm3, %v1618_v37, %v1554_v54  ;;  %3672 = vmatprep.mubr.msk.bf16.mxu0 %vm1006_vm4, %v4609_v12 }
 0x134   : > { %v1727_v24 = vshll.u32 %v1650_v18, 16  ;;  %v4747_v33 = vsel %vm590_vm0, %v1716_v58, %v1719_v7  ;;  %v1755_v58 = vrot.slane %v1753_v26, 1 }
 0x135   : > { %3626 = vmatprep.mubr.msk.bf16.mxu1 %vm1006_vm4, %v4747_v33 }
 0x136   : > { %v1729_v43 = vrot.slane %v1727_v24, 1  ;;  %v1490_v55 = vpop.permute.xlu1 %1489  ;;  %v1765_v24 = vrot.slane %v1763_v34, 1 }
 0x137   : > { %v1588_v36 = vsel %vm899_vm1, %v5907_v19, %v1490_v55  ;;  %v1600_v19 = vsel %vm899_vm1, %v4200_v16, %v1502_v23  ;;  %v1783_v16 = vshll.u32 %v4609_v12, 16 }
 0x138   : > { %v4752_v31 = vsel %vm590_vm0, %v1726_v32, %v1729_v43  ;;  %v1756_v32 = vor.u32 %v1755_v58, %v1751_v11 }
 0x139   : > { %3627 = vmatmul.mubr.msk.bf16.gmra.mrb[8].mxu1 %vm1006_vm4, %v4752_v31 }
 0x13a   : > { %v1492_v63 = vpop.permute.xlu1 %1491  ;;  %3673 = vmatmul.mubr.msk.bf16.gmra.mrb[52].mxu0 %vm1006_vm4, %v4605_v15 }
 0x13b   : > { %3676 = vmatprep.mubr.msk.bf16.mxu0 %vm1006_vm4, %v4642_v62  ;;  %v1590_v2 = vsel %vm899_vm1, %v4105_v52, %v1492_v63  ;;  %v1731_v52 = vshrl.u32 %v4532_v30, 16  ;;  %v1534_v63 = vpop.permute.xlu0 %1533 }
 0x13d   : > { %v1736_v57 = vor.u32 %v1735_v29, %v1731_v52  ;;  %v1771_v52 = vshrl.u32 %v4580_v53, 16  ;;  %v1775_v29 = vrot.slane %v1773_v5, 1  ;;  %v1791_v53 = vshrl.u32 %v4605_v15, 16 }
 0x13e   : > { %v1522_v3 = vpop.permute.xlu1 %1521 }
 0x13f   : > { %v1620_v40 = vsel %vm932_vm2, %v1588_v36, %v1522_v3 }
 0x142   : > { %v1524_v48 = vpop.permute.xlu1 %1523  ;;  %3677 = vmatmul.mubr.msk.bf16.gmra.mrb[56].mxu0 %vm1006_vm4, %v4637_v38 }
 0x143   : > { %v1622_v6 = vsel %vm932_vm2, %v1590_v2, %v1524_v48  ;;  %3680 = vmatprep.mubr.msk.bf16.mxu0 %vm1006_vm4, %v4670_v61  ;;  %v1766_v48 = vor.u32 %v1765_v24, %v1761_v60 }
 0x144   : > { %v1654_v8 = vsel %vm965_vm3, %v1622_v6, %v1558_v1  ;;  %v1568_v6 = vpop.permute.xlu0 %1567 }
 0x145   : > { %v1747_v27 = vshll.u32 %v1654_v8, 16 }
 0x146   : > { %v1556_v20 = vpop.permute.xlu1 %1555 }
 0x147   : > { %v1652_v4 = vsel %vm965_vm3, %v1620_v40, %v1556_v20  ;;  %v1749_v22 = vrot.slane %v1747_v27, 1  ;;  %v1632_v40 = vsel %vm932_vm2, %v1600_v19, %v1534_v63  ;;  %v1801_v19 = vshrl.u32 %v4642_v62, 16 }
 0x148   : > { %v1737_v45 = vshll.u32 %v1652_v4, 16  ;;  %v1506_v20 = vpop.permute.xlu0 %1505 }
 0x149   : > { %v4782_v30 = vsel %vm590_vm0, %v1746_v47, %v1749_v22  ;;  %v1664_v22 = vsel %vm965_vm3, %v1632_v40, %v1568_v6  ;;  %v1604_v11 = vsel %vm899_vm1, %v5895_v39, %v1506_v20  ;;  %v1803_v39 = vshll.u32 %v4642_v62, 16 }
 0x14a   : > { %v1739_v13 = vrot.slane %v1737_v45, 1  ;;  %v1494_v0 = vpop.permute.xlu1 %1493  ;;  %v1793_v45 = vshll.u32 %v4605_v15, 16  ;;  %v1797_v47 = vshll.u32 %v1664_v22, 16  ;;  %v1781_v15 = vshrl.u32 %v4609_v12, 16 }
 0x14b   : > { %v1592_v50 = vsel %vm899_vm1, %v4144_v21, %v1494_v0 }
 0x14c   : > { %v4777_v56 = vsel %vm590_vm0, %v1736_v57, %v1739_v13  ;;  %v1776_v57 = vor.u32 %v1775_v29, %v1771_v52  ;;  %v1795_v0 = vrot.slane %v1793_v45, 1 }
 0x14d   : > { %3630 = vmatprep.mubr.msk.bf16.mxu1 %vm1006_vm4, %v4777_v56 }
 0x14e   : > { %v1496_v42 = vpop.permute.xlu1 %1495  ;;  %3631 = vmatmul.mubr.msk.bf16.gmra.mrb[12].mxu1 %vm1006_vm4, %v4782_v30 }
 0x14f   : > { %v1594_v14 = vsel %vm899_vm1, %v4130_v9, %v1496_v42  ;;  %v1538_v42 = vpop.permute.xlu0 %1537 }
 0x150   : > { %v1636_v24 = vsel %vm932_vm2, %v1604_v11, %v1538_v42 }
 0x152   : > { %v1526_v35 = vpop.permute.xlu1 %1525 }
 0x153   : > { %v1624_v37 = vsel %vm932_vm2, %v1592_v50, %v1526_v35  ;;  %v3936_v35 = vld [vmem:[%s4024_s25 + $0x8c] ss:$0 sps:$4 sm:$0x11]  }
 0x156   : > { %v1528_v46 = vpop.permute.xlu1 %1527 }
 0x157   : > { %v1626_v43 = vsel %vm932_vm2, %v1594_v14, %v1528_v46  ;;  %v1785_v46 = vrot.slane %v1783_v16, 1 }
 0x15a   : > { %v1560_v7 = vpop.permute.xlu1 %1559 }
 0x15b   : > { %v1656_v54 = vsel %vm965_vm3, %v1624_v37, %v1560_v7  ;;  %v1796_v37 = vor.u32 %v1795_v0, %v1791_v53  ;;  %v1799_v7 = vrot.slane %v1797_v47, 1  ;;  %v1821_v53 = vshrl.u32 %v4670_v61, 16  ;;  %v5908_v47 = vld [vmem:[#allocation9_spill] sm:$0xff] }
 0x15c   : > { %v1757_v18 = vshll.u32 %v1656_v54, 16  ;;  %v1786_v54 = vor.u32 %v1785_v46, %v1781_v15 }
 0x15d   : > { %v4841_v12 = vsel %vm590_vm0, %v1796_v37, %v1799_v7 }
 0x15e   : > { %v1759_v55 = vrot.slane %v1757_v18, 1  ;;  %v1562_v21 = vpop.permute.xlu1 %1561 }
 0x15f   : > { %v1658_v3 = vsel %vm965_vm3, %v1626_v43, %v1562_v21 }
 0x160   : > { %v1767_v28 = vshll.u32 %v1658_v3, 16  ;;  %v4799_v2 = vsel %vm590_vm0, %v1756_v32, %v1759_v55  ;;  %v1572_v32 = vpop.permute.xlu0 %1571  ;;  %v1813_v55 = vshll.u32 %v4637_v38, 16  ;;  %v1811_v3 = vshrl.u32 %v4637_v38, 16 }
 0x161   : > { %3634 = vmatprep.mubr.msk.bf16.mxu1 %vm1006_vm4, %v4799_v2  ;;  %v1668_v21 = vsel %vm965_vm3, %v1636_v24, %v1572_v32 }
 0x162   : > { %v1769_v9 = vrot.slane %v1767_v28, 1  ;;  %v1498_v49 = vpop.permute.xlu1 %1497  ;;  %v1815_v60 = vrot.slane %v1813_v55, 1  ;;  %v1817_v28 = vshll.u32 %v1668_v21, 16 }
 0x163   : > { %v1596_v36 = vsel %vm899_vm1, %v4172_v44, %v1498_v49  ;;  %v1805_v49 = vrot.slane %v1803_v39, 1 }
 0x164   : > { %v4804_v1 = vsel %vm590_vm0, %v1766_v48, %v1769_v9  ;;  %v3937_v48 = vld [vmem:[%s4024_s25 + $0xa4] ss:$0 sps:$4 sm:$0x11]   ;;  %v1819_v52 = vrot.slane %v1817_v28, 1  ;;  %v2296_v62 = vpop.permute.xlu0 %2295 }
 0x165   : > { %3635 = vmatmul.mubr.msk.bf16.gmra.mrb[16].mxu1 %vm1006_vm4, %v4804_v1  ;;  %v1806_v29 = vor.u32 %v1805_v49, %v1801_v19  ;;  %v2322_v42 = vsel %vm899_vm1, %v5908_v47, %v2296_v62 }
 0x166   : > { %v1500_v8 = vpop.permute.xlu1 %1499 }
 0x167   : > { %v1598_v26 = vsel %vm899_vm1, %v3936_v35, %v1500_v8 }
 0x168   : > { %v2320_v35 = vpop.permute.xlu0 %2319 }
 0x16a   : > { %v1530_v27 = vpop.permute.xlu1 %1529 }
 0x16b   : > { %v1628_v25 = vsel %vm932_vm2, %v1596_v36, %v1530_v27  ;;  %v1816_v27 = vor.u32 %v1815_v60, %v1811_v3 }
 0x16c   : > { %v1660_v4 = vsel %vm965_vm3, %v1628_v25, %v1564_v10 }
 0x16d   : > { %v1777_v41 = vshll.u32 %v1660_v4, 16  ;;  %v4859_v25 = vsel %vm590_vm0, %v1816_v27, %v1819_v52  ;;  %v1823_v4 = vshll.u32 %v4670_v61, 16 }
 0x16e   : > { %v1532_v44 = vpop.permute.xlu1 %1531 }
 0x16f   : > { %v1779_v13 = vrot.slane %v1777_v41, 1  ;;  %v1630_v23 = vsel %vm932_vm2, %v1598_v26, %v1532_v44  ;;  %v3938_v41 = vld [vmem:[%s4024_s25 + $0xbc] ss:$0 sps:$4 sm:$0x11]   ;;  %v1825_v22 = vrot.slane %v1823_v4, 1 }
 0x171   : > { %v4824_v10 = vsel %vm590_vm0, %v1776_v57, %v1779_v13  ;;  %v1826_v26 = vor.u32 %v1825_v22, %v1821_v53 }
 0x172   : > { %v1566_v50 = vpop.permute.xlu1 %1565  ;;  %3638 = vmatprep.mubr.msk.bf16.mxu1 %vm1006_vm4, %v4824_v10 }
 0x173   : > { %v1662_v34 = vsel %vm965_vm3, %v1630_v23, %v1566_v50 }
 0x174   : > { %v1787_v58 = vshll.u32 %v1662_v34, 16 }
 0x176   : > { %v1789_v18 = vrot.slane %v1787_v58, 1  ;;  %v1504_v14 = vpop.permute.xlu1 %1503 }
 0x177   : > { %v1602_v9 = vsel %vm899_vm1, %v3937_v48, %v1504_v14 }
 0x178   : > { %v4835_v43 = vsel %vm590_vm0, %v1786_v54, %v1789_v18 }
 0x179   : > { %3639 = vmatmul.mubr.msk.bf16.gmra.mrb[20].mxu1 %vm1006_vm4, %v4835_v43 }
 0x17a   : > { %v1536_v63 = vpop.permute.xlu1 %1535  ;;  %3642 = vmatprep.mubr.msk.bf16.mxu1 %vm1006_vm4, %v4841_v12 }
 0x17b   : > { %v1634_v6 = vsel %vm932_vm2, %v1602_v9, %v1536_v63 }
 0x17e   : > { %v1570_v8 = vpop.permute.xlu1 %1569 }
 0x17f   : > { %v1666_v5 = vsel %vm965_vm3, %v1634_v6, %v1570_v8 }
 0x180   : > { %v1807_v36 = vshll.u32 %v1666_v5, 16 }
 0x182   : > { %v1809_v40 = vrot.slane %v1807_v36, 1  ;;  %v1508_v38 = vpop.permute.xlu1 %1507 }
 0x183   : > { %v1606_v16 = vsel %vm899_vm1, %v3938_v41, %v1508_v38 }
 0x184   : > { %v4854_v20 = vsel %vm590_vm0, %v1806_v29, %v1809_v40 }
 0x185   : > { %3643 = vmatmul.mubr.msk.bf16.gmra.mrb[24].mxu1 %vm1006_vm4, %v4854_v20 }
 0x186   : > { %v1540_v45 = vpop.permute.xlu1 %1539  ;;  %3646 = vmatprep.mubr.msk.bf16.mxu1 %vm1006_vm4, %v4859_v25 }
 0x187   : > { %v1638_v44 = vsel %vm932_vm2, %v1606_v16, %v1540_v45 }
 0x18a   : > { %v1574_v57 = vpop.permute.xlu1 %1573 }
 0x18b   : > { %v1670_v13 = vsel %vm965_vm3, %v1638_v44, %v1574_v57 }
 0x18c   : > { %v1827_v0 = vshll.u32 %v1670_v13, 16 }
 0x18e   : > { %v1829_v46 = vrot.slane %v1827_v0, 1  ;;  %v2303_v23 = vpop.permute.xlu1 %2302 }
 0x18f   : > { %v2324_v50 = vsel %vm932_vm2, %v2322_v42, %v2303_v23 }
 0x190   : > { %v4873_v34 = vsel %vm965_vm3, %v2324_v50, %v2320_v35  ;;  %v4876_v15 = vsel %vm590_vm0, %v1826_v26, %v1829_v46 }
 0x191   : > { %3647 = vmatmul.mubr.msk.bf16.gmra.mrb[28].mxu1 %vm1006_vm4, %v4876_v15  ;;  %3681 = vmatmul.mubr.msk.bf16.gmra.mrb[60].mxu0 %vm1006_vm4, %v4873_v34 }
 0x192   : > { %3686 = vmatprep.mubr.msk.bf16.mxu1 %vm1006_vm4, %v4662_v59  ;;  %v2746_v23 = vpop.permute.xlu1 %2745 }
 0x199   : > { %3687 = vmatmul.mubr.msk.bf16.vlgmr.msra.gmra.mrb[32].mxu1 %vm1006_vm4, %v4710_v51 }
 0x19a   : > { %3690 = vmatprep.mubr.msk.bf16.mxu1 %vm1006_vm4, %v4715_v17 }
 0x1a1   : > { %3691 = vmatmul.mubr.msk.bf16.gmra.mrb[36].mxu1 %vm1006_vm4, %v4747_v33 }
 0x1a2   : > { %3694 = vmatprep.mubr.msk.bf16.mxu1 %vm1006_vm4, %v4752_v31 }
 0x1a5   : > { %v4892_v61 = vpop.f32.mrb[0].mxu0 }
 0x1a6   : > { %v4894_v11 = vpop.f32.mrb[1].mxu0  ;;  %v1272_v51 = vmul.f32 %v4892_v61, %v4892_v61  ;;  %v1203_v54 = vsel %vm932_vm2, %v4892_v61, 0.0 }
 0x1a7   : > { %v1270_v58 = vmul.f32 %v4894_v11, %v4894_v11  ;;  %v4898_v59 = vpop.f32.mrb[2].mxu0  ;;  %v1200_v17 = vsel %vm932_vm2, %v4894_v11, 0.0 }
 0x1a8   : > { %v4900_v37 = vpop.f32.mrb[3].mxu0  ;;  %v1273_v18 = vmul.f32 %v4898_v59, %v4898_v59  ;;  %v1305_v55 = vsel %vm932_vm2, %v1272_v51, 0.0  ;;  %v1205_v39 = vsel %vm932_vm2, %v4898_v59, 0.0 }
 0x1a9   : > { %3695 = vmatmul.mubr.msk.bf16.gmra.mrb[40].mxu1 %vm1006_vm4, %v4777_v56  ;;  %v1201_v33 = vsel %vm932_vm2, %v4900_v37, 0.0  ;;  %v1271_v31 = vmul.f32 %v4900_v37, %v4900_v37  ;;  %v1302_v56 = vsel %vm932_vm2, %v1270_v58, 0.0 }
 0x1aa   : > { %3698 = vmatprep.mubr.msk.bf16.mxu1 %vm1006_vm4, %v4782_v30  ;;  %v1202_v7 = vadd.f32 %v1201_v33, %v1200_v17  ;;  %v1307_v60 = vsel %vm932_vm2, %v1273_v18, 0.0 }
 0x1ab   : > { %v1303_v14 = vsel %vm932_vm2, %v1271_v31, 0.0 }
 0x1ac   : > { %v1204_v24 = vadd.f32 %v1203_v54, %v1202_v7  ;;  %v1304_v32 = vadd.f32 %v1303_v14, %v1302_v56  ;;  %v3939_v7 = vld [vmem:[%s4234_s30 + $0x8] ss:$0 sps:$4 sm:$0x11]   ;;  %v2748_v14 = vpop.permute.xlu0 %2747 }
 0x1ad   : > { %v4923_v21 = vpop.f32.mrb[4].mxu0  ;;  %v2754_v54 = vsel %vm899_vm1, %v3939_v7, %v2746_v23 }
 0x1ae   : > { %v1306_v30 = vadd.f32 %v1305_v55, %v1304_v32  ;;  %v4925_v63 = vpop.f32.mrb[5].mxu0  ;;  %v1206_v3 = vadd.f32 %v1205_v39, %v1204_v24  ;;  %v1276_v5 = vmul.f32 %v4923_v21, %v4923_v21  ;;  %v1211_v40 = vsel %vm932_vm2, %v4923_v21, 0.0 }
 0x1af   : > { %v1207_v28 = vsel %vm932_vm2, %v4925_v63, 0.0  ;;  %v1274_v48 = vmul.f32 %v4925_v63, %v4925_v63  ;;  %v4932_v9 = vpop.f32.mrb[6].mxu0 }
 0x1b0   : > { %v1208_v49 = vadd.f32 %v1207_v28, %v1206_v3  ;;  %v1308_v6 = vadd.f32 %v1307_v60, %v1306_v30  ;;  %v4934_v8 = vpop.f32.mrb[7].mxu0  ;;  %v1313_v62 = vsel %vm932_vm2, %v1276_v5, 0.0  ;;  %v1213_v41 = vsel %vm932_vm2, %v4932_v9, 0.0  ;;  %v2752_v28 = vpop.permute.xlu1 %2751 }
 0x1b1   : > { %3699 = vmatmul.mubr.msk.bf16.gmra.mrb[44].mxu1 %vm1006_vm4, %v4799_v2  ;;  %v1309_v19 = vsel %vm932_vm2, %v1274_v48, 0.0  ;;  %v1209_v36 = vsel %vm932_vm2, %v4934_v8, 0.0  ;;  %v1275_v27 = vmul.f32 %v4934_v8, %v4934_v8  ;;  %v1277_v2 = vmul.f32 %v4932_v9, %v4932_v9 }
 0x1b2   : > { %3702 = vmatprep.mubr.msk.bf16.mxu1 %vm1006_vm4, %v4804_v1  ;;  %v1310_v52 = vadd.f32 %v1309_v19, %v1308_v6  ;;  %v1210_v29 = vadd.f32 %v1209_v36, %v1208_v49  ;;  %v2756_v60 = vsel %vm932_vm2, %v2754_v54, %v2748_v14  ;;  %v2761_v5 = vshll.u32 %v4873_v34, 16 }
 0x1b3   : > { %v1311_v38 = vsel %vm932_vm2, %v1275_v27, 0.0  ;;  %v1315_v57 = vsel %vm932_vm2, %v1277_v2, 0.0 }
 0x1b4   : > { %v1212_v4 = vadd.f32 %v1211_v40, %v1210_v29  ;;  %v1312_v45 = vadd.f32 %v1311_v38, %v1310_v52  ;;  %v2758_v38 = vsel %vm965_vm3, %v2756_v60, %v2752_v28 }
 0x1b5   : > { %v4955_v16 = vpop.f32.mrb[8].mxu0 }
 0x1b6   : > { %v1314_v1 = vadd.f32 %v1313_v62, %v1312_v45  ;;  %v4957_v22 = vpop.f32.mrb[9].mxu0  ;;  %v1214_v44 = vadd.f32 %v1213_v41, %v1212_v4  ;;  %v1280_v26 = vmul.f32 %v4955_v16, %v4955_v16 }
 0x1b7   : > { %v1215_v13 = vsel %vm932_vm2, %v4957_v22, 0.0  ;;  %v1278_v53 = vmul.f32 %v4957_v22, %v4957_v22  ;;  %v4964_v0 = vpop.f32.mrb[10].mxu0 }
 0x1b8   : > { %v1216_v47 = vadd.f32 %v1215_v13, %v1214_v44  ;;  %v1316_v42 = vadd.f32 %v1315_v57, %v1314_v1  ;;  %v4966_v35 = vpop.f32.mrb[11].mxu0  ;;  %v1281_v33 = vmul.f32 %v4964_v0, %v4964_v0  ;;  %v1321_v24 = vsel %vm932_vm2, %v1280_v26, 0.0 }
 0x1b9   : > { %3703 = vmatmul.mubr.msk.bf16.gmra.mrb[48].mxu1 %vm1006_vm4, %v4824_v10  ;;  %v1317_v46 = vsel %vm932_vm2, %v1278_v53, 0.0  ;;  %v1217_v50 = vsel %vm932_vm2, %v4966_v35, 0.0  ;;  %v1279_v58 = vmul.f32 %v4966_v35, %v4966_v35  ;;  %v1219_v10 = vsel %vm932_vm2, %v4955_v16, 0.0 }
 0x1ba   : > { %3706 = vmatprep.mubr.msk.bf16.mxu1 %vm1006_vm4, %v4835_v43  ;;  %v1318_v51 = vadd.f32 %v1317_v46, %v1316_v42  ;;  %v1218_v17 = vadd.f32 %v1217_v50, %v1216_v47  ;;  %v1221_v43 = vsel %vm932_vm2, %v4964_v0, 0.0  ;;  %v1323_v3 = vsel %vm932_vm2, %v1281_v33, 0.0 }
 0x1bb   : > { %v1319_v31 = vsel %vm932_vm2, %v1279_v58, 0.0  ;;  %v2759_v1 = vshrl.u32 %v4873_v34, 16  ;;  %v2763_v44 = vrot.slane %v2761_v5, 1  ;;  %v2765_v53 = vshll.u32 %v2758_v38, 16 }
 0x1bc   : > { %v1220_v56 = vadd.f32 %v1219_v10, %v1218_v17  ;;  %v1320_v18 = vadd.f32 %v1319_v31, %v1318_v51 }
 0x1bd   : > { %v4989_v32 = vpop.f32.mrb[12].mxu0  ;;  %v2764_v33 = vor.u32 %v2763_v44, %v2759_v1 }
 0x1be   : > { %v1322_v55 = vadd.f32 %v1321_v24, %v1320_v18  ;;  %v4991_v39 = vpop.f32.mrb[13].mxu0  ;;  %v1222_v30 = vadd.f32 %v1221_v43, %v1220_v56  ;;  %v1284_v52 = vmul.f32 %v4989_v32, %v4989_v32  ;;  %v1227_v62 = vsel %vm932_vm2, %v4989_v32, 0.0 }
 0x1bf   : > { %v1223_v48 = vsel %vm932_vm2, %v4991_v39, 0.0  ;;  %v1282_v49 = vmul.f32 %v4991_v39, %v4991_v39  ;;  %v4999_v6 = vpop.f32.mrb[14].mxu0  ;;  %v2767_v56 = vrot.slane %v2765_v53, 1 }
 0x1c0   : > { %v1224_v19 = vadd.f32 %v1223_v48, %v1222_v30  ;;  %v1324_v36 = vadd.f32 %v1323_v3, %v1322_v55  ;;  %v5002_v27 = vpop.f32.mrb[15].mxu0  ;;  %v1229_v42 = vsel %vm932_vm2, %v4999_v6, 0.0 }
 0x1c1   : > { %3707 = vmatmul.mubr.msk.bf16.gmra.mrb[52].mxu1 %vm1006_vm4, %v4841_v12  ;;  %v1325_v29 = vsel %vm932_vm2, %v1282_v49, 0.0  ;;  %v1225_v40 = vsel %vm932_vm2, %v5002_v27, 0.0  ;;  %v1283_v2 = vmul.f32 %v5002_v27, %v5002_v27  ;;  %v1285_v12 = vmul.f32 %v4999_v6, %v4999_v6 }
 0x1c2   : > { %3710 = vmatprep.mubr.msk.bf16.mxu1 %vm1006_vm4, %v4854_v20  ;;  %v1326_v4 = vadd.f32 %v1325_v29, %v1324_v36  ;;  %v1226_v45 = vadd.f32 %v1225_v40, %v1224_v19  ;;  %v1329_v20 = vsel %vm932_vm2, %v1284_v52, 0.0  ;;  %v2768_v19 = vsel %vm590_vm0, %v2764_v33, %v2767_v56 }
 0x1c3   : > { %v1327_v41 = vsel %vm932_vm2, %v1283_v2, 0.0  ;;  %v1331_v26 = vsel %vm932_vm2, %v1285_v12, 0.0 }
 0x1c4   : > { %v1228_v57 = vadd.f32 %v1227_v62, %v1226_v45  ;;  %v1328_v13 = vadd.f32 %v1327_v41, %v1326_v4 }
 0x1c5   : > { %v3602_v47 = vpop.f32.mrb[16].mxu0 }
 0x1c6   : > { %v1330_v46 = vadd.f32 %v1329_v20, %v1328_v13  ;;  %v3752_v23 = vpack.i.bf16 %v3602_v47, %v4892_v61  ;;  %v1137_v50 = vpop.f32.mrb[17].mxu0  ;;  %v1230_v58 = vadd.f32 %v1229_v42, %v1228_v57  ;;  %v1288_v24 = vmul.f32 %v3602_v47, %v3602_v47 }
 0x1c7   : > { %v1231_v51 = vsel %vm932_vm2, %v1137_v50, 0.0  ;;  %v1286_v34 = vmul.f32 %v1137_v50, %v1137_v50  ;;  %v3603_v17 = vpop.f32.mrb[18].mxu0  ;;  %v3748_v10 = vpack.i.bf16 %v1137_v50, %v4894_v11  ;;  %v1235_v30 = vsel %vm932_vm2, %v3602_v47, 0.0 }
 0x1c8   : > { %v1332_v31 = vadd.f32 %v1331_v26, %v1330_v46  ;;  %v3754_v7 = vpack.i.bf16 %v3603_v17, %v4898_v59  ;;  %v1140_v54 = vpop.f32.mrb[19].mxu0  ;;  %v1232_v18 = vadd.f32 %v1231_v51, %v1230_v58  ;;  %v1289_v3 = vmul.f32 %v3603_v17, %v3603_v17 }
 0x1c9   : > { %3711 = vmatmul.mubr.msk.bf16.gmra.mrb[56].mxu1 %vm1006_vm4, %v4859_v25  ;;  %v1333_v61 = vsel %vm932_vm2, %v1286_v34, 0.0  ;;  %v3750_v14 = vpack.i.bf16 %v1140_v54, %v4900_v37  ;;  %3749 = vxpose.xlu0.b32.start [1/16] (narrow) %v3748_v10, 8  ;;  %v1233_v43 = vsel %vm932_vm2, %v1140_v54, 0.0  ;;  %v1287_v55 = vmul.f32 %v1140_v54, %v1140_v54 }
 0x1ca   : > { %3714 = vmatprep.mubr.msk.bf16.mxu1 %vm1006_vm4, %v4876_v15  ;;  %v1334_v11 = vadd.f32 %v1333_v61, %v1332_v31  ;;  %v1234_v59 = vadd.f32 %v1233_v43, %v1232_v18  ;;  %v1337_v37 = vsel %vm932_vm2, %v1288_v24, 0.0  ;;  %v1237_v15 = vsel %vm932_vm2, %v3603_v17, 0.0 }
 0x1cb   : > { %v1335_v25 = vsel %vm932_vm2, %v1287_v55, 0.0  ;;  %v1339_v38 = vsel %vm932_vm2, %v1289_v3, 0.0 }
 0x1cc   : > { %v1236_v60 = vadd.f32 %v1235_v30, %v1234_v59  ;;  %v1336_v28 = vadd.f32 %v1335_v25, %v1334_v11 }
 0x1cd   : > { %3751 = vxpose.xlu0.b32.cont [2/16] (narrow) %v3750_v14, 8  ;;  %v5039_v48 = vpop.f32.mrb[20].mxu0 }
 0x1ce   : > { %v3760_v49 = vpack.i.bf16 %v5039_v48, %v4923_v21  ;;  %v1153_v5 = vpop.f32.mrb[21].mxu0  ;;  %v1338_v36 = vadd.f32 %v1337_v37, %v1336_v28  ;;  %v1238_v52 = vadd.f32 %v1237_v15, %v1236_v60  ;;  %v1243_v47 = vsel %vm932_vm2, %v5039_v48, 0.0 }
 0x1cf   : > { %v3756_v29 = vpack.i.bf16 %v1153_v5, %v4925_v63  ;;  %v1239_v40 = vsel %vm932_vm2, %v1153_v5, 0.0  ;;  %v5048_v2 = vpop.f32.mrb[22].mxu0  ;;  %v1290_v4 = vmul.f32 %v1153_v5, %v1153_v5  ;;  %v1292_v63 = vmul.f32 %v5039_v48, %v5039_v48 }
 0x1d0   : > { %v3762_v12 = vpack.i.bf16 %v5048_v2, %v4932_v9  ;;  %v1156_v45 = vpop.f32.mrb[23].mxu0  ;;  %v1340_v62 = vadd.f32 %v1339_v38, %v1338_v36  ;;  %v1240_v41 = vadd.f32 %v1239_v40, %v1238_v52  ;;  %v1293_v42 = vmul.f32 %v5048_v2, %v5048_v2 }
 0x1d1   : > { %3715 = vmatmul.mubr.msk.bf16.gmra.mrb[60].mxu1 %vm1006_vm4, %v2768_v19  ;;  %v3758_v1 = vpack.i.bf16 %v1156_v45, %v4934_v8  ;;  %3753 = vxpose.xlu0.b32.cont [3/16] (narrow) %v3752_v23, 8  ;;  %v1341_v44 = vsel %vm932_vm2, %v1290_v4, 0.0  ;;  %v1241_v57 = vsel %vm932_vm2, %v1156_v45, 0.0  ;;  %v1291_v13 = vmul.f32 %v1156_v45, %v1156_v45 }
 0x1d2   : > { %v1342_v53 = vadd.f32 %v1341_v44, %v1340_v62  ;;  %v1242_v20 = vadd.f32 %v1241_v57, %v1240_v41  ;;  %v1345_v50 = vsel %vm932_vm2, %v1292_v63, 0.0  ;;  %v1245_v58 = vsel %vm932_vm2, %v5048_v2, 0.0 }
 0x1d3   : > { %v1343_v26 = vsel %vm932_vm2, %v1291_v13, 0.0  ;;  %v1347_v54 = vsel %vm932_vm2, %v1293_v42, 0.0 }
 0x1d4   : > { %v1244_v8 = vadd.f32 %v1243_v47, %v1242_v20  ;;  %v1344_v46 = vadd.f32 %v1343_v26, %v1342_v53 }
 0x1d5   : > { %3755 = vxpose.xlu0.b32.cont [4/16] (narrow) %v3754_v7, 8  ;;  %v5064_v23 = vpop.f32.mrb[24].mxu0 }
 0x1d6   : > { %v3768_v51 = vpack.i.bf16 %v5064_v23, %v4955_v16  ;;  %v5071_v34 = vpop.f32.mrb[25].mxu0  ;;  %v1346_v17 = vadd.f32 %v1345_v50, %v1344_v46  ;;  %v1246_v10 = vadd.f32 %v1245_v58, %v1244_v8  ;;  %v1296_v43 = vmul.f32 %v5064_v23, %v5064_v23 }
 0x1d7   : > { %v3764_v33 = vpack.i.bf16 %v5071_v34, %v4957_v22  ;;  %v1247_v31 = vsel %vm932_vm2, %v5071_v34, 0.0  ;;  %v5077_v7 = vpop.f32.mrb[26].mxu0  ;;  %v1294_v56 = vmul.f32 %v5071_v34, %v5071_v34  ;;  %v1251_v28 = vsel %vm932_vm2, %v5064_v23, 0.0 }
 0x1d8   : > { %v3770_v18 = vpack.i.bf16 %v5077_v7, %v4964_v0  ;;  %v5084_v61 = vpop.f32.mrb[27].mxu0  ;;  %v1348_v14 = vadd.f32 %v1347_v54, %v1346_v17  ;;  %v1248_v24 = vadd.f32 %v1247_v31, %v1246_v10  ;;  %v1297_v37 = vmul.f32 %v5077_v7, %v5077_v7 }
 0x1d9   : > { %v3766_v11 = vpack.i.bf16 %v5084_v61, %v4966_v35  ;;  %3757 = vxpose.xlu0.b32.cont [5/16] (narrow) %v3756_v29, 8  ;;  %v1349_v55 = vsel %vm932_vm2, %v1294_v56, 0.0  ;;  %v1249_v59 = vsel %vm932_vm2, %v5084_v61, 0.0  ;;  %v1295_v30 = vmul.f32 %v5084_v61, %v5084_v61 }
 0x1da   : > { %v1350_v3 = vadd.f32 %v1349_v55, %v1348_v14  ;;  %v1250_v25 = vadd.f32 %v1249_v59, %v1248_v24  ;;  %v1353_v40 = vsel %vm932_vm2, %v1296_v43, 0.0  ;;  %v1253_v38 = vsel %vm932_vm2, %v5077_v7, 0.0 }
 0x1db   : > { %v1351_v15 = vsel %vm932_vm2, %v1295_v30, 0.0  ;;  %v1355_v53 = vsel %vm932_vm2, %v1297_v37, 0.0 }
 0x1dc   : > { %v5095_v60 = vpop.f32.mrb[0].mxu1  ;;  %v1252_v19 = vadd.f32 %v1251_v28, %v1250_v25  ;;  %v1352_v36 = vadd.f32 %v1351_v15, %v1350_v3 }
 0x1dd   : > { %v5102_v5 = vpop.f32.mrb[1].mxu1  ;;  %3759 = vxpose.xlu0.b32.cont [6/16] (narrow) %v3758_v1, 8  ;;  %v5104_v52 = vpop.f32.mrb[28].mxu0  ;;  %v2121_v4 = vmul.f32 %v5095_v60, %v5095_v60  ;;  %v2052_v26 = vsel %vm932_vm2, %v5095_v60, 0.0 }
 0x1de   : > { %v5106_v29 = vpop.f32.mrb[2].mxu1  ;;  %v3776_v45 = vpack.i.bf16 %v5104_v52, %v4989_v32  ;;  %v5115_v62 = vpop.f32.mrb[29].mxu0  ;;  %v1354_v1 = vadd.f32 %v1353_v40, %v1352_v36  ;;  %v1254_v63 = vadd.f32 %v1253_v38, %v1252_v19  ;;  %v2119_v50 = vmul.f32 %v5102_v5, %v5102_v5 }
 0x1df   : > { %v5117_v41 = vpop.f32.mrb[3].mxu1  ;;  %v3772_v44 = vpack.i.bf16 %v5115_v62, %v4991_v39  ;;  %v1255_v57 = vsel %vm932_vm2, %v5115_v62, 0.0  ;;  %v5123_v13 = vpop.f32.mrb[30].mxu0  ;;  %v1298_v20 = vmul.f32 %v5115_v62, %v5115_v62  ;;  %v2154_v58 = vsel %vm932_vm2, %v2121_v4, 0.0 }
 0x1e0   : > { %v3778_v47 = vpack.i.bf16 %v5123_v13, %v4999_v6  ;;  %v5130_v42 = vpop.f32.mrb[31].mxu0  ;;  %v1356_v8 = vadd.f32 %v1355_v53, %v1354_v1  ;;  %v1256_v46 = vadd.f32 %v1255_v57, %v1254_v63  ;;  %v2049_v10 = vsel %vm932_vm2, %v5102_v5, 0.0 }
 0x1e1   : > { %3761 = vxpose.xlu0.b32.cont [7/16] (narrow) %v3760_v49, 8  ;;  %v1357_v17 = vsel %vm932_vm2, %v1298_v20, 0.0  ;;  %v3774_v31 = vpack.i.bf16 %v5130_v42, %v5002_v27  ;;  %v1300_v54 = vmul.f32 %v5104_v52, %v5104_v52  ;;  %v1257_v14 = vsel %vm932_vm2, %v5130_v42, 0.0 }
 0x1e2   : > { %v1358_v56 = vadd.f32 %v1357_v17, %v1356_v8  ;;  %v1299_v21 = vmul.f32 %v5130_v42, %v5130_v42  ;;  %v1301_v48 = vmul.f32 %v5123_v13, %v5123_v13  ;;  %v1258_v49 = vadd.f32 %v1257_v14, %v1256_v46 }
 0x1e3   : > { %v2050_v24 = vsel %vm932_vm2, %v5117_v41, 0.0  ;;  %v2120_v43 = vmul.f32 %v5117_v41, %v5117_v41  ;;  %v1259_v55 = vsel %vm932_vm2, %v5104_v52, 0.0  ;;  %v2151_v59 = vsel %vm932_vm2, %v2119_v50, 0.0 }
 0x1e4   : > { %v1359_v30 = vsel %vm932_vm2, %v1299_v21, 0.0  ;;  %v2051_v3 = vadd.f32 %v2050_v24, %v2049_v10  ;;  %v2122_v28 = vmul.f32 %v5106_v29, %v5106_v29  ;;  %v1260_v37 = vadd.f32 %v1259_v55, %v1258_v49 }
 0x1e5   : > { %3763 = vxpose.xlu0.b32.cont [8/16] (narrow) %v3762_v12, 8  ;;  %v5164_v25 = vpop.f32.mrb[32].mxu0  ;;  %v1360_v15 = vadd.f32 %v1359_v30, %v1358_v56  ;;  %v2152_v19 = vsel %vm932_vm2, %v2120_v43, 0.0  ;;  %v1361_v40 = vsel %vm932_vm2, %v1300_v54, 0.0  ;;  %v1261_v38 = vsel %vm932_vm2, %v5123_v13, 0.0 }
 0x1e6   : > { %v5169_v36 = vpop.f32.mrb[33].mxu0  ;;  %v2053_v4 = vadd.f32 %v2052_v26, %v2051_v3  ;;  %v2153_v1 = vadd.f32 %v2152_v19, %v2151_v59  ;;  %v1363_v2 = vsel %vm932_vm2, %v1301_v48, 0.0  ;;  %v2054_v12 = vsel %vm932_vm2, %v5106_v29, 0.0 }
 0x1e7   : > { %v5174_v9 = vpop.f32.mrb[34].mxu0  ;;  %v5179_v63 = vadd.f32 %v1261_v38, %v1260_v37  ;;  %v1362_v57 = vadd.f32 %v1361_v40, %v1360_v15  ;;  %v2499_v8 = vsel %vm932_vm2, %v5169_v36, 0.0  ;;  %v2569_v26 = vmul.f32 %v5169_v36, %v5169_v36 }
 0x1e8   : > { %v5181_v53 = vpop.f32.mrb[35].mxu0  ;;  %v2155_v20 = vadd.f32 %v2154_v58, %v2153_v1  ;;  %v2156_v50 = vsel %vm932_vm2, %v2122_v28, 0.0  ;;  %v2502_v58 = vsel %vm932_vm2, %v5164_v25, 0.0  ;;  %v2571_v54 = vmul.f32 %v5164_v25, %v5164_v25 }
 0x1e9   : > { %v2500_v46 = vsel %vm932_vm2, %v5181_v53, 0.0  ;;  %3765 = vxpose.xlu0.b32.cont [9/16] (narrow) %v3764_v33, 8  ;;  %v5193_v17 = vadd.f32 %v1363_v2, %v1362_v57  ;;  %v2570_v56 = vmul.f32 %v5181_v53, %v5181_v53  ;;  %v2055_v14 = vadd.f32 %v2054_v12, %v2053_v4 }
 0x1ea   : > { %v2501_v10 = vadd.f32 %v2500_v46, %v2499_v8  ;;  %v2157_v21 = vadd.f32 %v2156_v50, %v2155_v20  ;;  %v2601_v22 = vsel %vm932_vm2, %v2569_v26, 0.0  ;;  %v2572_v34 = vmul.f32 %v5174_v9, %v5174_v9 }
 0x1eb   : > { %v2602_v33 = vsel %vm932_vm2, %v2570_v56, 0.0  ;;  %v2504_v24 = vsel %vm932_vm2, %v5174_v9, 0.0  ;;  %v2604_v59 = vsel %vm932_vm2, %v2571_v54, 0.0 }
 0x1ec   : > { %v2503_v48 = vadd.f32 %v2502_v58, %v2501_v10  ;;  %v2603_v43 = vadd.f32 %v2602_v33, %v2601_v22 }
 0x1ed   : > { %3767 = vxpose.xlu0.b32.cont [10/16] (narrow) %v3766_v11, 8  ;;  %v5208_v49 = vpop.f32.mrb[36].mxu0  ;;  %v2606_v11 = vsel %vm932_vm2, %v2572_v34, 0.0 }
 0x1ee   : > { %v5212_v55 = vpop.f32.mrb[37].mxu0  ;;  %v2505_v30 = vadd.f32 %v2504_v24, %v2503_v48  ;;  %v2605_v35 = vadd.f32 %v2604_v59, %v2603_v43  ;;  %v2575_v40 = vmul.f32 %v5208_v49, %v5208_v49  ;;  %v2510_v57 = vsel %vm932_vm2, %v5208_v49, 0.0 }
 0x1ef   : > { %v2506_v3 = vsel %vm932_vm2, %v5212_v55, 0.0  ;;  %v2573_v28 = vmul.f32 %v5212_v55, %v5212_v55  ;;  %v5219_v37 = vpop.f32.mrb[38].mxu0 }
 0x1f0   : > { %v5221_v61 = vpop.f32.mrb[39].mxu0  ;;  %v2507_v15 = vadd.f32 %v2506_v3, %v2505_v30  ;;  %v2607_v38 = vadd.f32 %v2606_v11, %v2605_v35  ;;  %v2612_v10 = vsel %vm932_vm2, %v2575_v40, 0.0  ;;  %v2512_v54 = vsel %vm932_vm2, %v5219_v37, 0.0 }
 0x1f1   : > { %v2608_v19 = vsel %vm932_vm2, %v2573_v28, 0.0  ;;  %3769 = vxpose.xlu0.b32.cont [11/16] (narrow) %v3768_v51, 8  ;;  %v2508_v4 = vsel %vm932_vm2, %v5221_v61, 0.0  ;;  %v2574_v1 = vmul.f32 %v5221_v61, %v5221_v61  ;;  %v2576_v51 = vmul.f32 %v5219_v37, %v5219_v37 }
 0x1f2   : > { %v2509_v2 = vadd.f32 %v2508_v4, %v2507_v15  ;;  %v2609_v20 = vadd.f32 %v2608_v19, %v2607_v38 }
 0x1f3   : > { %v2610_v16 = vsel %vm932_vm2, %v2574_v1, 0.0  ;;  %v2614_v3 = vsel %vm932_vm2, %v2576_v51, 0.0 }
 0x1f4   : > { %v5234_v12 = vpop.f32.mrb[4].mxu1  ;;  %v2511_v8 = vadd.f32 %v2510_v57, %v2509_v2  ;;  %v2611_v56 = vadd.f32 %v2610_v16, %v2609_v20 }
 0x1f5   : > { %v5239_v23 = vpop.f32.mrb[5].mxu1  ;;  %3771 = vxpose.xlu0.b32.cont [12/16] (narrow) %v3770_v18, 8  ;;  %v5246_v26 = vpop.f32.mrb[40].mxu0  ;;  %v2125_v35 = vmul.f32 %v5234_v12, %v5234_v12 }
 0x1f6   : > { %v2056_v46 = vsel %vm932_vm2, %v5239_v23, 0.0  ;;  %v2123_v50 = vmul.f32 %v5239_v23, %v5239_v23  ;;  %v5252_v58 = vpop.f32.mrb[6].mxu1  ;;  %v5257_v48 = vpop.f32.mrb[41].mxu0  ;;  %v2513_v22 = vadd.f32 %v2512_v54, %v2511_v8  ;;  %v2613_v24 = vadd.f32 %v2612_v10, %v2611_v56 }
 0x1f7   : > { %v5259_v0 = vpop.f32.mrb[7].mxu1  ;;  %v2057_v7 = vadd.f32 %v2056_v46, %v2055_v14  ;;  %v2514_v34 = vsel %vm932_vm2, %v5257_v48, 0.0  ;;  %v5264_v33 = vpop.f32.mrb[42].mxu0  ;;  %v2577_v59 = vmul.f32 %v5257_v48, %v5257_v48  ;;  %v2060_v14 = vsel %vm932_vm2, %v5234_v12, 0.0 }
 0x1f8   : > { %v2158_v18 = vsel %vm932_vm2, %v2123_v50, 0.0  ;;  %v5268_v30 = vpop.f32.mrb[43].mxu0  ;;  %v2515_v28 = vadd.f32 %v2514_v34, %v2513_v22  ;;  %v2615_v11 = vadd.f32 %v2614_v3, %v2613_v24  ;;  %v2058_v15 = vsel %vm932_vm2, %v5259_v0, 0.0 }
 0x1f9   : > { %v2159_v43 = vadd.f32 %v2158_v18, %v2157_v21  ;;  %3773 = vxpose.xlu0.b32.cont [13/16] (narrow) %v3772_v44, 8  ;;  %v2616_v21 = vsel %vm932_vm2, %v2577_v59, 0.0  ;;  %v2518_v19 = vsel %vm932_vm2, %v5246_v26, 0.0  ;;  %v2059_v40 = vadd.f32 %v2058_v15, %v2057_v7 }
 0x1fa   : > { %v2124_v38 = vmul.f32 %v5259_v0, %v5259_v0  ;;  %v2516_v39 = vsel %vm932_vm2, %v5268_v30, 0.0  ;;  %v2579_v62 = vmul.f32 %v5246_v26, %v5246_v26  ;;  %v2617_v44 = vadd.f32 %v2616_v21, %v2615_v11 }
 0x1fb   : > { %v2517_v4 = vadd.f32 %v2516_v39, %v2515_v28  ;;  %v2578_v1 = vmul.f32 %v5268_v30, %v5268_v30  ;;  %v2126_v2 = vmul.f32 %v5252_v58, %v5252_v58  ;;  %v2580_v57 = vmul.f32 %v5264_v33, %v5264_v33 }
 0x1fc   : > { %v2061_v20 = vadd.f32 %v2060_v14, %v2059_v40  ;;  %v2160_v16 = vsel %vm932_vm2, %v2124_v38, 0.0  ;;  %v2162_v8 = vsel %vm932_vm2, %v2125_v35, 0.0  ;;  %v2520_v56 = vsel %vm932_vm2, %v5264_v33, 0.0 }
 0x1fd   : > { %3775 = vxpose.xlu0.b32.cont [14/16] (narrow) %v3774_v31, 8  ;;  %v5299_v51 = vpop.f32.mrb[44].mxu0  ;;  %v2161_v46 = vadd.f32 %v2160_v16, %v2159_v43  ;;  %v2519_v50 = vadd.f32 %v2518_v19, %v2517_v4  ;;  %v2618_v10 = vsel %vm932_vm2, %v2578_v1, 0.0  ;;  %v2620_v31 = vsel %vm932_vm2, %v2579_v62, 0.0 }
 0x1fe   : > { %v5303_v54 = vpop.f32.mrb[45].mxu0  ;;  %v2619_v7 = vadd.f32 %v2618_v10, %v2617_v44  ;;  %v2062_v22 = vsel %vm932_vm2, %v5252_v58, 0.0  ;;  %v2164_v59 = vsel %vm932_vm2, %v2126_v2, 0.0  ;;  %v2622_v3 = vsel %vm932_vm2, %v2580_v57, 0.0 }
 0x1ff   : > { %v2522_v18 = vsel %vm932_vm2, %v5303_v54, 0.0  ;;  %v2581_v27 = vmul.f32 %v5303_v54, %v5303_v54  ;;  %v5311_v42 = vpop.f32.mrb[46].mxu0  ;;  %v2163_v34 = vadd.f32 %v2162_v8, %v2161_v46  ;;  %v2521_v24 = vadd.f32 %v2520_v56, %v2519_v50 }
 0x200   : > { %v5316_v43 = vpop.f32.mrb[47].mxu0  ;;  %v2621_v14 = vadd.f32 %v2620_v31, %v2619_v7  ;;  %v2063_v15 = vadd.f32 %v2062_v22, %v2061_v20  ;;  %v2583_v38 = vmul.f32 %v5299_v51, %v5299_v51  ;;  %v2526_v44 = vsel %vm932_vm2, %v5299_v51, 0.0 }
 0x201   : > { %v2524_v28 = vsel %vm932_vm2, %v5316_v43, 0.0  ;;  %3777 = vxpose.xlu0.b32.cont [15/16] (narrow) %v3776_v45, 8  ;;  %v2523_v35 = vadd.f32 %v2522_v18, %v2521_v24  ;;  %v2624_v11 = vsel %vm932_vm2, %v2581_v27, 0.0  ;;  %v2582_v21 = vmul.f32 %v5316_v43, %v5316_v43 }
 0x202   : > { %v2623_v19 = vadd.f32 %v2622_v3, %v2621_v14  ;;  %v2165_v40 = vadd.f32 %v2164_v59, %v2163_v34  ;;  %v2584_v52 = vmul.f32 %v5311_v42, %v5311_v42  ;;  %v2528_v4 = vsel %vm932_vm2, %v5311_v42, 0.0 }
 0x203   : > { %v2525_v39 = vadd.f32 %v2524_v28, %v2523_v35  ;;  %v2626_v62 = vsel %vm932_vm2, %v2582_v21, 0.0  ;;  %v2628_v10 = vsel %vm932_vm2, %v2583_v38, 0.0 }
 0x204   : > { %v2625_v32 = vadd.f32 %v2624_v11, %v2623_v19  ;;  %v2630_v56 = vsel %vm932_vm2, %v2584_v52, 0.0 }
 0x205   : > { %3779 = vxpose.xlu0.b32.end [16/16] (narrow) %v3778_v47, 8  ;;  %v3670_v45 = vpop.f32.mrb[48].mxu0  ;;  %v2527_v1 = vadd.f32 %v2526_v44, %v2525_v39 }
 0x206   : > { %v3826_v2 = vpack.i.bf16 %v3670_v45, %v5164_v25  ;;  %v2436_v57 = vpop.f32.mrb[49].mxu0  ;;  %v2627_v20 = vadd.f32 %v2626_v62, %v2625_v32  ;;  %v2587_v25 = vmul.f32 %v3670_v45, %v3670_v45  ;;  %v2534_v59 = vsel %vm932_vm2, %v3670_v45, 0.0 }
 0x207   : > { %v3822_v16 = vpack.i.bf16 %v2436_v57, %v5169_v36  ;;  %v2530_v8 = vsel %vm932_vm2, %v2436_v57, 0.0  ;;  %v2585_v46 = vmul.f32 %v2436_v57, %v2436_v57  ;;  %v5343_v50 = vpop.f32.mrb[50].mxu0  ;;  %v2529_v6 = vadd.f32 %v2528_v4, %v2527_v1 }
 0x208   : > { %v3828_v13 = vpack.i.bf16 %v5343_v50, %v5174_v9  ;;  %v2439_v47 = vpop.f32.mrb[51].mxu0  ;;  %v2629_v7 = vadd.f32 %v2628_v10, %v2627_v20  ;;  %v2636_v38 = vsel %vm932_vm2, %v2587_v25, 0.0  ;;  %v2536_v45 = vsel %vm932_vm2, %v5343_v50, 0.0 }
 0x209   : > { %v3824_v18 = vpack.i.bf16 %v2439_v47, %v5181_v53  ;;  %3823 = vxpose.xlu1.b32.start [1/16] (narrow) %v3822_v16, 8  ;;  %v2531_v36 = vadd.f32 %v2530_v8, %v2529_v6  ;;  %v2632_v27 = vsel %vm932_vm2, %v2585_v46, 0.0  ;;  %v2532_v31 = vsel %vm932_vm2, %v2439_v47, 0.0 }
 0x20a   : > { %v2586_v22 = vmul.f32 %v2439_v47, %v2439_v47  ;;  %v2631_v34 = vadd.f32 %v2630_v56, %v2629_v7  ;;  %v2588_v53 = vmul.f32 %v5343_v50, %v5343_v50 }
 0x20b   : > { %v2533_v9 = vadd.f32 %v2532_v31, %v2531_v36 }
 0x20c   : > { %v5352_v24 = vpop.f32.mrb[8].mxu1  ;;  %v2634_v3 = vsel %vm932_vm2, %v2586_v22, 0.0  ;;  %v2633_v28 = vadd.f32 %v2632_v27, %v2631_v34  ;;  %v2638_v47 = vsel %vm932_vm2, %v2588_v53, 0.0 }
 0x20d   : > { %v5356_v14 = vpop.f32.mrb[9].mxu1  ;;  %3825 = vxpose.xlu1.b32.cont [2/16] (narrow) %v3824_v18, 8  ;;  %v5360_v35 = vpop.f32.mrb[52].mxu0  ;;  %v2535_v39 = vadd.f32 %v2534_v59, %v2533_v9  ;;  %v2129_v62 = vmul.f32 %v5352_v24, %v5352_v24  ;;  %v2068_v50 = vsel %vm932_vm2, %v5352_v24, 0.0 }
 0x20e   : > { %v2064_v11 = vsel %vm932_vm2, %v5356_v14, 0.0  ;;  %v2127_v21 = vmul.f32 %v5356_v14, %v5356_v14  ;;  %v5366_v19 = vpop.f32.mrb[10].mxu1  ;;  %v3834_v44 = vpack.i.bf16 %v5360_v35, %v5208_v49  ;;  %v2452_v32 = vpop.f32.mrb[53].mxu0  ;;  %v2635_v4 = vadd.f32 %v2634_v3, %v2633_v28 }
 0x20f   : > { %v5373_v52 = vpop.f32.mrb[11].mxu1  ;;  %v2065_v1 = vadd.f32 %v2064_v11, %v2063_v15  ;;  %v5378_v20 = vpop.f32.mrb[54].mxu0  ;;  %v2537_v8 = vadd.f32 %v2536_v45, %v2535_v39  ;;  %v3830_v46 = vpack.i.bf16 %v2452_v32, %v5212_v55  ;;  %v2538_v10 = vsel %vm932_vm2, %v2452_v32, 0.0 }
 0x210   : > { %v2166_v57 = vsel %vm932_vm2, %v2127_v21, 0.0  ;;  %v2455_v6 = vpop.f32.mrb[55].mxu0  ;;  %v2637_v56 = vadd.f32 %v2636_v38, %v2635_v4  ;;  %v2589_v7 = vmul.f32 %v2452_v32, %v2452_v32  ;;  %v2170_v15 = vsel %vm932_vm2, %v2129_v62, 0.0 }
 0x211   : > { %v2167_v16 = vadd.f32 %v2166_v57, %v2165_v40  ;;  %3827 = vxpose.xlu1.b32.cont [3/16] (narrow) %v3826_v2, 8  ;;  %v2539_v25 = vadd.f32 %v2538_v10, %v2537_v8  ;;  %v3836_v40 = vpack.i.bf16 %v5378_v20, %v5219_v37  ;;  %v2591_v55 = vmul.f32 %v5360_v35, %v5360_v35 }
 0x212   : > { %v2639_v18 = vadd.f32 %v2638_v47, %v2637_v56  ;;  %v2640_v36 = vsel %vm932_vm2, %v2589_v7, 0.0  ;;  %v2066_v27 = vsel %vm932_vm2, %v5373_v52, 0.0  ;;  %v2542_v2 = vsel %vm932_vm2, %v5360_v35, 0.0 }
 0x213   : > { %v2067_v31 = vadd.f32 %v2066_v27, %v2065_v1  ;;  %v2128_v22 = vmul.f32 %v5373_v52, %v5373_v52  ;;  %v3832_v34 = vpack.i.bf16 %v2455_v6, %v5221_v61  ;;  %v2592_v9 = vmul.f32 %v5378_v20, %v5378_v20 }
 0x214   : > { %v2641_v59 = vadd.f32 %v2640_v36, %v2639_v18  ;;  %v2540_v3 = vsel %vm932_vm2, %v2455_v6, 0.0  ;;  %v2590_v28 = vmul.f32 %v2455_v6, %v2455_v6  ;;  %v2644_v61 = vsel %vm932_vm2, %v2591_v55, 0.0 }
 0x215   : > { %3829 = vxpose.xlu1.b32.cont [4/16] (narrow) %v3828_v13, 8  ;;  %v5401_v53 = vpop.f32.mrb[56].mxu0  ;;  %v2069_v11 = vadd.f32 %v2068_v50, %v2067_v31  ;;  %v2168_v21 = vsel %vm932_vm2, %v2128_v22, 0.0  ;;  %v2541_v38 = vadd.f32 %v2540_v3, %v2539_v25  ;;  %v2130_v32 = vmul.f32 %v5366_v19, %v5366_v19 }
 0x216   : > { %v3842_v39 = vpack.i.bf16 %v5401_v53, %v5246_v26  ;;  %v5406_v62 = vpop.f32.mrb[57].mxu0  ;;  %v2169_v45 = vadd.f32 %v2168_v21, %v2167_v16  ;;  %v2642_v4 = vsel %vm932_vm2, %v2590_v28, 0.0  ;;  %v2544_v1 = vsel %vm932_vm2, %v5378_v20, 0.0 }
 0x217   : > { %v5412_v13 = vpop.f32.mrb[58].mxu0  ;;  %v2543_v57 = vadd.f32 %v2542_v2, %v2541_v38  ;;  %v2643_v8 = vadd.f32 %v2642_v4, %v2641_v59  ;;  %v3838_v10 = vpack.i.bf16 %v5406_v62, %v5257_v48  ;;  %v2546_v56 = vsel %vm932_vm2, %v5406_v62, 0.0 }
 0x218   : > { %v2471_v6 = vpop.f32.mrb[59].mxu0  ;;  %v2171_v47 = vadd.f32 %v2170_v15, %v2169_v45  ;;  %v2593_v16 = vmul.f32 %v5406_v62, %v5406_v62  ;;  %v3844_v7 = vpack.i.bf16 %v5412_v13, %v5264_v33  ;;  %v2070_v50 = vsel %vm932_vm2, %v5366_v19, 0.0 }
 0x219   : > { %3831 = vxpose.xlu1.b32.cont [5/16] (narrow) %v3830_v46, 8  ;;  %v2646_v25 = vsel %vm932_vm2, %v2592_v9, 0.0  ;;  %v2645_v55 = vadd.f32 %v2644_v61, %v2643_v8  ;;  %v2545_v18 = vadd.f32 %v2544_v1, %v2543_v57  ;;  %v3840_v15 = vpack.i.bf16 %v2471_v6, %v5268_v30 }
 0x21a   : > { %v2648_v48 = vsel %vm932_vm2, %v2593_v16, 0.0  ;;  %v2548_v36 = vsel %vm932_vm2, %v2471_v6, 0.0  ;;  %v2594_v27 = vmul.f32 %v2471_v6, %v2471_v6  ;;  %v2172_v2 = vsel %vm932_vm2, %v2130_v32, 0.0 }
 0x21b   : > { %v2647_v31 = vadd.f32 %v2646_v25, %v2645_v55  ;;  %v2547_v22 = vadd.f32 %v2546_v56, %v2545_v18  ;;  %v2071_v33 = vadd.f32 %v2070_v50, %v2069_v11  ;;  %v2595_v46 = vmul.f32 %v5401_v53, %v5401_v53 }
 0x21c   : > { %v2650_v59 = vsel %vm932_vm2, %v2594_v27, 0.0  ;;  %v2173_v9 = vadd.f32 %v2172_v2, %v2171_v47  ;;  %v2550_v30 = vsel %vm932_vm2, %v5401_v53, 0.0  ;;  %v2596_v21 = vmul.f32 %v5412_v13, %v5412_v13 }
 0x21d   : > { %3833 = vxpose.xlu1.b32.cont [6/16] (narrow) %v3832_v34, 8  ;;  %v2649_v3 = vadd.f32 %v2648_v48, %v2647_v31  ;;  %v2549_v28 = vadd.f32 %v2548_v36, %v2547_v22  ;;  %v2652_v11 = vsel %vm932_vm2, %v2595_v46, 0.0  ;;  %v2552_v32 = vsel %vm932_vm2, %v5412_v13, 0.0 }
 0x21e   : > { %v2654_v6 = vsel %vm932_vm2, %v2596_v21, 0.0 }
 0x21f   : > { %v2551_v38 = vadd.f32 %v2550_v30, %v2549_v28  ;;  %v2651_v62 = vadd.f32 %v2650_v59, %v2649_v3 }
 0x221   : > { %v5438_v61 = vpop.f32.mrb[12].mxu1  ;;  %3835 = vxpose.xlu1.b32.cont [7/16] (narrow) %v3834_v44, 8  ;;  %v2653_v45 = vadd.f32 %v2652_v11, %v2651_v62  ;;  %v5454_v8 = vadd.f32 %v2552_v32, %v2551_v38 }
 0x222   : > { %v5446_v34 = vpop.f32.mrb[13].mxu1  ;;  %v2133_v13 = vmul.f32 %v5438_v61, %v5438_v61  ;;  %v2076_v55 = vsel %vm932_vm2, %v5438_v61, 0.0 }
 0x223   : > { %v2072_v4 = vsel %vm932_vm2, %v5446_v34, 0.0  ;;  %v2131_v1 = vmul.f32 %v5446_v34, %v5446_v34  ;;  %v5452_v57 = vpop.f32.mrb[14].mxu1  ;;  %v5466_v16 = vadd.f32 %v2654_v6, %v2653_v45 }
 0x224   : > { %v2073_v49 = vadd.f32 %v2072_v4, %v2071_v33  ;;  %v5459_v35 = vpop.f32.mrb[15].mxu1  ;;  %v2134_v18 = vmul.f32 %v5452_v57, %v5452_v57  ;;  %v2178_v2 = vsel %vm932_vm2, %v2133_v13, 0.0  ;;  %v2078_v31 = vsel %vm932_vm2, %v5452_v57, 0.0 }
 0x225   : > { %v2174_v44 = vsel %vm932_vm2, %v2131_v1, 0.0  ;;  %v2074_v47 = vsel %vm932_vm2, %v5459_v35, 0.0  ;;  %v2132_v56 = vmul.f32 %v5459_v35, %v5459_v35  ;;  %3837 = vxpose.xlu1.b32.cont [8/16] (narrow) %v3836_v40, 8 }
 0x226   : > { %v2175_v50 = vadd.f32 %v2174_v44, %v2173_v9  ;;  %v2075_v25 = vadd.f32 %v2074_v47, %v2073_v49  ;;  %v2180_v20 = vsel %vm932_vm2, %v2134_v18, 0.0 }
 0x227   : > { %v2176_v48 = vsel %vm932_vm2, %v2132_v56, 0.0 }
 0x228   : > { %v2077_v36 = vadd.f32 %v2076_v55, %v2075_v25  ;;  %v2177_v27 = vadd.f32 %v2176_v48, %v2175_v50 }
 0x229   : > { %3839 = vxpose.xlu1.b32.cont [9/16] (narrow) %v3838_v10, 8 }
 0x22a   : > { %v2179_v22 = vadd.f32 %v2178_v2, %v2177_v27  ;;  %v2079_v37 = vadd.f32 %v2078_v31, %v2077_v36 }
 0x22c   : > { %v2181_v40 = vadd.f32 %v2180_v20, %v2179_v22 }
 0x22d   : > { %3841 = vxpose.xlu1.b32.cont [10/16] (narrow) %v3840_v15, 8 }
 0x231   : > { %3843 = vxpose.xlu1.b32.cont [11/16] (narrow) %v3842_v39, 8 }
 0x235   : > { %3845 = vxpose.xlu1.b32.cont [12/16] (narrow) %v3844_v7, 8 }
 0x238   : > { %v3636_v33 = vpop.f32.mrb[16].mxu1 }
 0x239   : > { %v3789_v46 = vpack.i.bf16 %v3636_v33, %v5095_v60  ;;  %v1986_v59 = vpop.f32.mrb[17].mxu1  ;;  %v2137_v39 = vmul.f32 %v3636_v33, %v3636_v33  ;;  %v2084_v11 = vsel %vm932_vm2, %v3636_v33, 0.0 }
 0x23a   : > { %v2080_v9 = vsel %vm932_vm2, %v1986_v59, 0.0  ;;  %v2135_v3 = vmul.f32 %v1986_v59, %v1986_v59  ;;  %v3637_v28 = vpop.f32.mrb[18].mxu1  ;;  %v3785_v10 = vpack.i.bf16 %v1986_v59, %v5102_v5 }
 0x23b   : > { %v2081_v30 = vadd.f32 %v2080_v9, %v2079_v37  ;;  %v3791_v21 = vpack.i.bf16 %v3637_v28, %v5106_v29  ;;  %v1989_v38 = vpop.f32.mrb[19].mxu1  ;;  %v2138_v32 = vmul.f32 %v3637_v28, %v3637_v28  ;;  %v2086_v29 = vsel %vm932_vm2, %v3637_v28, 0.0 }
 0x23c   : > { %v2182_v15 = vsel %vm932_vm2, %v2135_v3, 0.0  ;;  %v3787_v26 = vpack.i.bf16 %v1989_v38, %v5117_v41  ;;  %v2082_v53 = vsel %vm932_vm2, %v1989_v38, 0.0  ;;  %3786 = vxpose.xlu0.b32.start [1/16] (narrow) %v3785_v10, 8  ;;  %v2136_v62 = vmul.f32 %v1989_v38, %v1989_v38 }
 0x23d   : > { %v2183_v60 = vadd.f32 %v2182_v15, %v2181_v40  ;;  %v2083_v7 = vadd.f32 %v2082_v53, %v2081_v30  ;;  %v2186_v1 = vsel %vm932_vm2, %v2137_v39, 0.0  ;;  %v2188_v13 = vsel %vm932_vm2, %v2138_v32, 0.0 }
 0x23e   : > { %v2184_v5 = vsel %vm932_vm2, %v2136_v62, 0.0 }
 0x23f   : > { %v2085_v45 = vadd.f32 %v2084_v11, %v2083_v7  ;;  %v2185_v4 = vadd.f32 %v2184_v5, %v2183_v60  ;;  %v1263_v7 = vrot.slane %v5179_v63, 4  ;;  %v1365_v5 = vrot.slane %v5193_v17, 4 }
 0x240   : > { %3788 = vxpose.xlu0.b32.cont [2/16] (narrow) %v3787_v26, 8 }
 0x241   : > { %v2087_v41 = vadd.f32 %v2086_v29, %v2085_v45  ;;  %v2187_v6 = vadd.f32 %v2186_v1, %v2185_v4 }
 0x243   : > { %v2189_v49 = vadd.f32 %v2188_v13, %v2187_v6 }
 0x244   : > { %3790 = vxpose.xlu0.b32.cont [3/16] (narrow) %v3789_v46, 8 }
 0x248   : > { %3792 = vxpose.xlu0.b32.cont [4/16] (narrow) %v3791_v21, 8 }
 0x249   : > { %v3780_v47 = vpop.trf.xlu0 }
 0x24a   : > { %v3781_v59 = vunpack.i.l.bf16 %v3780_v47 }
 0x24c   : > { %v3640_v44 = vpop.f32.mrb[20].mxu1 }
 0x24d   : > { %v3797_v56 = vpack.i.bf16 %v3640_v44, %v5234_v12  ;;  %v2002_v50 = vpop.f32.mrb[21].mxu1  ;;  %v2141_v36 = vmul.f32 %v3640_v44, %v3640_v44  ;;  %v3784_v12 = vunpack.i.h.bf16 %v3780_v47  ;;  %v2092_v46 = vsel %vm932_vm2, %v3640_v44, 0.0 }
 0x24e   : > { %v3793_v25 = vpack.i.bf16 %v2002_v50, %v5239_v23  ;;  %v2088_v55 = vsel %vm932_vm2, %v2002_v50, 0.0  ;;  %v2139_v18 = vmul.f32 %v2002_v50, %v2002_v50  ;;  %v3641_v48 = vpop.f32.mrb[22].mxu1  ;;  %v1264_v47 = vadd.f32 %v1263_v7, %v5179_v63 }
 0x24f   : > { %v2089_v27 = vadd.f32 %v2088_v55, %v2087_v41  ;;  %v3799_v2 = vpack.i.bf16 %v3641_v48, %v5252_v58  ;;  %v2005_v31 = vpop.f32.mrb[23].mxu1  ;;  %v2142_v9 = vmul.f32 %v3641_v48, %v3641_v48  ;;  %v3510_v10 = vpack.c.bf16 %v3784_v12, %v3781_v59 }
 0x250   : > { %v2190_v22 = vsel %vm932_vm2, %v2139_v18, 0.0  ;;  %v3795_v37 = vpack.i.bf16 %v2005_v31, %v5259_v0  ;;  %v2090_v20 = vsel %vm932_vm2, %v2005_v31, 0.0  ;;  %3794 = vxpose.xlu0.b32.cont [5/16] (narrow) %v3793_v25, 8  ;;  %v2140_v33 = vmul.f32 %v2005_v31, %v2005_v31 }
 0x251   : > { %v2191_v40 = vadd.f32 %v2190_v22, %v2189_v49  ;;  %v2091_v23 = vadd.f32 %v2090_v20, %v2089_v27  ;;  %v2094_v0 = vsel %vm932_vm2, %v3641_v48, 0.0  ;;  %v2194_v30 = vsel %vm932_vm2, %v2141_v36, 0.0  ;;  %1444 = vst [vmem:[%s5508_s27] sm:$0xff] %v3510_v10 }
 0x252   : > { %v2192_v58 = vsel %vm932_vm2, %v2140_v33, 0.0  ;;  %v2196_v15 = vsel %vm932_vm2, %v2142_v9, 0.0  ;;  %v1366_v50 = vadd.f32 %v1365_v5, %v5193_v17 }
 0x253   : > { %v2093_v3 = vadd.f32 %v2092_v46, %v2091_v23  ;;  %v2193_v28 = vadd.f32 %v2192_v58, %v2191_v40 }
 0x254   : > { %3796 = vxpose.xlu0.b32.cont [6/16] (narrow) %v3795_v37, 8  ;;  %v1367_v31 = vrot.slane %v1366_v50, 2 }
 0x255   : > { %v2095_v21 = vadd.f32 %v2094_v0, %v2093_v3  ;;  %v2195_v38 = vadd.f32 %v2194_v30, %v2193_v28 }
 0x256   : > { %v5552_v0 = vadd.f32 %v1367_v31, %v1366_v50 }
 0x257   : > { %v2197_v53 = vadd.f32 %v2196_v15, %v2195_v38 }
 0x258   : > { %3798 = vxpose.xlu0.b32.cont [7/16] (narrow) %v3797_v56, 8  ;;  %v3644_v26 = vpop.f32.mrb[24].mxu1 }
 0x259   : > { %v3805_v39 = vpack.i.bf16 %v3644_v26, %v5352_v24  ;;  %v2018_v60 = vpop.f32.mrb[25].mxu1  ;;  %v2100_v56 = vsel %vm932_vm2, %v3644_v26, 0.0 }
 0x25a   : > { %v3801_v62 = vpack.i.bf16 %v2018_v60, %v5356_v14  ;;  %v2096_v11 = vsel %vm932_vm2, %v2018_v60, 0.0  ;;  %v2143_v32 = vmul.f32 %v2018_v60, %v2018_v60  ;;  %v5518_v45 = vpop.f32.mrb[26].mxu1  ;;  %v2145_v14 = vmul.f32 %v3644_v26, %v3644_v26 }
 0x25b   : > { %v2097_v29 = vadd.f32 %v2096_v11, %v2095_v21  ;;  %v3807_v4 = vpack.i.bf16 %v5518_v45, %v5366_v19  ;;  %v2021_v1 = vpop.f32.mrb[27].mxu1  ;;  %v2146_v25 = vmul.f32 %v5518_v45, %v5518_v45 }
 0x25c   : > { %v2198_v41 = vsel %vm932_vm2, %v2143_v32, 0.0  ;;  %v3803_v24 = vpack.i.bf16 %v2021_v1, %v5373_v52  ;;  %v2098_v6 = vsel %vm932_vm2, %v2021_v1, 0.0  ;;  %3800 = vxpose.xlu0.b32.cont [8/16] (narrow) %v3799_v2, 8  ;;  %v2144_v44 = vmul.f32 %v2021_v1, %v2021_v1 }
 0x25d   : > { %v2199_v13 = vadd.f32 %v2198_v41, %v2197_v53  ;;  %v2099_v49 = vadd.f32 %v2098_v6, %v2097_v29  ;;  %v2102_v52 = vsel %vm932_vm2, %v5518_v45, 0.0  ;;  %v2202_v36 = vsel %vm932_vm2, %v2145_v14, 0.0 }
 0x25e   : > { %v2200_v18 = vsel %vm932_vm2, %v2144_v44, 0.0  ;;  %v1265_v2 = vrot.slane %v1264_v47, 2  ;;  %v2204_v22 = vsel %vm932_vm2, %v2146_v25, 0.0 }
 0x25f   : > { %v2101_v55 = vadd.f32 %v2100_v56, %v2099_v49  ;;  %v2201_v48 = vadd.f32 %v2200_v18, %v2199_v13 }
 0x260   : > { %3802 = vxpose.xlu0.b32.cont [9/16] (narrow) %v3801_v62, 8  ;;  %v5544_v46 = vadd.f32 %v1265_v2, %v1264_v47 }
 0x261   : > { %v2103_v27 = vadd.f32 %v2102_v52, %v2101_v55  ;;  %v2203_v63 = vadd.f32 %v2202_v36, %v2201_v48 }
 0x263   : > { %v2205_v20 = vadd.f32 %v2204_v22, %v2203_v63 }
 0x264   : > { %3804 = vxpose.xlu0.b32.cont [10/16] (narrow) %v3803_v24, 8  ;;  %v5536_v17 = vpop.f32.mrb[28].mxu1  ;;  %v5538_v37 = vpop.f32.mrb[60].mxu0 }
 0x265   : > { %v3813_v12 = vpack.i.bf16 %v5536_v17, %v5438_v61  ;;  %v3850_v40 = vpack.i.bf16 %v5538_v37, %v5299_v51  ;;  %v2034_v23 = vpop.f32.mrb[29].mxu1  ;;  %v2484_v33 = vpop.f32.mrb[61].mxu0  ;;  %v2108_v15 = vsel %vm932_vm2, %v5536_v17, 0.0  ;;  %v2149_v60 = vmul.f32 %v5536_v17, %v5536_v17 }
 0x266   : > { %v3809_v59 = vpack.i.bf16 %v2034_v23, %v5446_v34  ;;  %v2104_v9 = vsel %vm932_vm2, %v2034_v23, 0.0  ;;  %v5548_v3 = vpop.f32.mrb[30].mxu1  ;;  %v5550_v58 = vpop.f32.mrb[62].mxu0  ;;  %v2147_v10 = vmul.f32 %v2034_v23, %v2034_v23  ;;  %v3846_v30 = vpack.i.bf16 %v2484_v33, %v5303_v54 }
 0x267   : > { %v2105_v28 = vadd.f32 %v2104_v9, %v2103_v27  ;;  %v5555_v21 = vpop.f32.mrb[31].mxu1  ;;  %v2487_v38 = vpop.f32.mrb[63].mxu0  ;;  %v2554_v34 = vsel %vm932_vm2, %v2484_v33, 0.0  ;;  %v2597_v26 = vmul.f32 %v2484_v33, %v2484_v33  ;;  %v3815_v53 = vpack.i.bf16 %v5548_v3, %v5452_v57 }
 0x268   : > { %3806 = vxpose.xlu0.b32.cont [11/16] (narrow) %v3805_v39, 8  ;;  %v2558_v7 = vsel %vm932_vm2, %v5538_v37, 0.0  ;;  %v2206_v54 = vsel %vm932_vm2, %v2147_v10, 0.0  ;;  %v2555_v62 = vadd.f32 %v2554_v34, %v5454_v8  ;;  %3847 = vxpose.xlu1.b32.cont [13/16] (narrow) %v3846_v30, 8  ;;  %v2599_v11 = vmul.f32 %v5538_v37, %v5538_v37 }
 0x269   : > { %v2207_v32 = vadd.f32 %v2206_v54, %v2205_v20  ;;  %v2656_v5 = vsel %vm932_vm2, %v2597_v26, 0.0  ;;  %v3852_v39 = vpack.i.bf16 %v5550_v58, %v5311_v42  ;;  %v2150_v1 = vmul.f32 %v5548_v3, %v5548_v3 }
 0x26a   : > { %v2657_v29 = vadd.f32 %v2656_v5, %v5466_v16  ;;  %v2600_v41 = vmul.f32 %v5550_v58, %v5550_v58  ;;  %v3811_v8 = vpack.i.bf16 %v5555_v21, %v5459_v35  ;;  %v2106_v24 = vsel %vm932_vm2, %v5555_v21, 0.0 }
 0x26b   : > { %v2148_v6 = vmul.f32 %v5555_v21, %v5555_v21  ;;  %v3848_v14 = vpack.i.bf16 %v2487_v38, %v5316_v43  ;;  %v2556_v42 = vsel %vm932_vm2, %v2487_v38, 0.0  ;;  %v2210_v13 = vsel %vm932_vm2, %v2149_v60, 0.0 }
 0x26c   : > { %3808 = vxpose.xlu0.b32.cont [12/16] (narrow) %v3807_v4, 8  ;;  %v5589_v16 = vpop.f32.mrb[32].mxu1  ;;  %v2107_v49 = vadd.f32 %v2106_v24, %v2105_v28  ;;  %v2557_v35 = vadd.f32 %v2556_v42, %v2555_v62  ;;  %v2598_v44 = vmul.f32 %v2487_v38, %v2487_v38  ;;  %v2660_v56 = vsel %vm932_vm2, %v2599_v11, 0.0 }
 0x26d   : > { %v5592_v47 = vpop.f32.mrb[33].mxu1  ;;  %v2110_v43 = vsel %vm932_vm2, %v5548_v3, 0.0  ;;  %v2560_v50 = vsel %vm932_vm2, %v5550_v58, 0.0  ;;  %v2208_v19 = vsel %vm932_vm2, %v2148_v6, 0.0  ;;  %3849 = vxpose.xlu1.b32.cont [14/16] (narrow) %v3848_v14, 8  ;;  %v2212_v48 = vsel %vm932_vm2, %v2150_v1, 0.0 }
 0x26e   : > { %v5600_v45 = vpop.f32.mrb[34].mxu1  ;;  %v2109_v4 = vadd.f32 %v2108_v15, %v2107_v49  ;;  %v2209_v25 = vadd.f32 %v2208_v19, %v2207_v32  ;;  %v2559_v55 = vadd.f32 %v2558_v7, %v2557_v35  ;;  %v2658_v18 = vsel %vm932_vm2, %v2598_v44, 0.0 }
 0x26f   : > { %v5603_v52 = vpop.f32.mrb[35].mxu1  ;;  %v2662_v36 = vsel %vm932_vm2, %v2600_v41, 0.0  ;;  %v2659_v27 = vadd.f32 %v2658_v18, %v2657_v29  ;;  %v3012_v2 = vmul.f32 %v5592_v47, %v5592_v47  ;;  %v2945_v20 = vsel %vm932_vm2, %v5589_v16, 0.0 }
 0x270   : > { %3810 = vxpose.xlu0.b32.cont [13/16] (narrow) %v3809_v59, 8  ;;  %v2111_v63 = vadd.f32 %v2110_v43, %v2109_v4  ;;  %v2211_v31 = vadd.f32 %v2210_v13, %v2209_v25  ;;  %v2561_v22 = vadd.f32 %v2560_v50, %v2559_v55  ;;  %v3014_v33 = vmul.f32 %v5589_v16, %v5589_v16 }
 0x271   : > { %v2661_v23 = vadd.f32 %v2660_v56, %v2659_v27  ;;  %v2943_v9 = vsel %vm932_vm2, %v5603_v52, 0.0  ;;  %v3013_v58 = vmul.f32 %v5603_v52, %v5603_v52  ;;  %3851 = vxpose.xlu1.b32.cont [15/16] (narrow) %v3850_v40, 8  ;;  %v2942_v30 = vsel %vm932_vm2, %v5592_v47, 0.0 }
 0x272   : > { %v2112_v59 = vrot.slane %v2111_v63, 4  ;;  %v2213_v28 = vadd.f32 %v2212_v48, %v2211_v31  ;;  %v2562_v10 = vrot.slane %v2561_v22, 4  ;;  %v3044_v38 = vsel %vm932_vm2, %v3012_v2, 0.0 }
 0x273   : > { %v2663_v21 = vadd.f32 %v2662_v36, %v2661_v23  ;;  %v2944_v15 = vadd.f32 %v2943_v9, %v2942_v30  ;;  %v3045_v34 = vsel %vm932_vm2, %v3013_v58, 0.0  ;;  %v3015_v51 = vmul.f32 %v5600_v45, %v5600_v45 }
 0x274   : > { %3812 = vxpose.xlu0.b32.cont [14/16] (narrow) %v3811_v8, 8  ;;  %v5624_v26 = vpop.f32.mrb[36].mxu1  ;;  %v2113_v60 = vadd.f32 %v2112_v59, %v2111_v63  ;;  %v2214_v7 = vrot.slane %v2213_v28, 4  ;;  %v3046_v37 = vadd.f32 %v3045_v34, %v3044_v38  ;;  %v3047_v62 = vsel %vm932_vm2, %v3014_v33, 0.0 }
 0x275   : > { %v5628_v40 = vpop.f32.mrb[37].mxu1  ;;  %v2664_v54 = vrot.slane %v2663_v21, 4  ;;  %v2946_v11 = vadd.f32 %v2945_v20, %v2944_v15  ;;  %3853 = vxpose.xlu1.b32.end [16/16] (narrow) %v3852_v39, 8  ;;  %v1369_v5 = vrot.slane %v5552_v0, 1  ;;  %v2563_v1 = vadd.f32 %v2562_v10, %v2561_v22 }
 0x276   : > { %v5631_v32 = vpop.f32.mrb[38].mxu1  ;;  %v2215_v29 = vadd.f32 %v2214_v7, %v2213_v28  ;;  %v2947_v41 = vsel %vm932_vm2, %v5600_v45, 0.0  ;;  %v3048_v8 = vadd.f32 %v3047_v62, %v3046_v37  ;;  %v2949_v42 = vsel %vm932_vm2, %v5628_v40, 0.0 }
 0x277   : > { %v5636_v24 = vpop.f32.mrb[39].mxu1  ;;  %v2665_v6 = vadd.f32 %v2664_v54, %v2663_v21  ;;  %v2948_v14 = vadd.f32 %v2947_v41, %v2946_v11  ;;  %v1267_v39 = vrot.slane %v5544_v46, 1  ;;  %v2114_v13 = vrot.slane %v2113_v60, 2 }
 0x278   : > { %3814 = vxpose.xlu0.b32.cont [15/16] (narrow) %v3813_v12, 8  ;;  %v2216_v49 = vrot.slane %v2215_v29, 2  ;;  %v3049_v35 = vsel %vm932_vm2, %v3015_v51, 0.0  ;;  %v3016_v44 = vmul.f32 %v5628_v40, %v5628_v40  ;;  %v1370_v19 = vadd.f32 %v1369_v5, %v5552_v0 }
 0x279   : > { %v2666_v56 = vrot.slane %v2665_v6, 2  ;;  %v2950_v43 = vadd.f32 %v2949_v42, %v2948_v14  ;;  %v3050_v50 = vadd.f32 %v3049_v35, %v3048_v8  ;;  %v2564_v25 = vrot.slane %v2563_v1, 2 }
 0x27a   : > { %v2217_v4 = vadd.f32 %v2216_v49, %v2215_v29  ;;  %v3051_v55 = vsel %vm932_vm2, %v3016_v44, 0.0  ;;  %v2951_v61 = vsel %vm932_vm2, %v5636_v24, 0.0  ;;  %v3018_v17 = vmul.f32 %v5624_v26, %v5624_v26 }
 0x27b   : > { %v3052_v12 = vadd.f32 %v3051_v55, %v3050_v50  ;;  %v2952_v18 = vadd.f32 %v2951_v61, %v2950_v43  ;;  %v3017_v48 = vmul.f32 %v5636_v24, %v5636_v24  ;;  %v2115_v36 = vadd.f32 %v2114_v13, %v2113_v60 }
 0x27c   : > { %3816 = vxpose.xlu0.b32.end [16/16] (narrow) %v3815_v53, 8  ;;  %v5658_v0 = vpop.f32.mrb[40].mxu1  ;;  %v2667_v27 = vadd.f32 %v2666_v56, %v2665_v6  ;;  %v2953_v2 = vsel %vm932_vm2, %v5624_v26, 0.0  ;;  %v2218_v31 = vrot.slane %v2217_v4, 1  ;;  %v3019_v22 = vmul.f32 %v5631_v32, %v5631_v32 }
 0x27d   : > { %v5662_v63 = vpop.f32.mrb[41].mxu1  ;;  %v2954_v20 = vadd.f32 %v2953_v2, %v2952_v18  ;;  %v3053_v23 = vsel %vm932_vm2, %v3017_v48, 0.0  ;;  %v2565_v53 = vadd.f32 %v2564_v25, %v2563_v1  ;;  %v2955_v33 = vsel %vm932_vm2, %v5631_v32, 0.0 }
 0x27e   : > { %v3020_v57 = vmul.f32 %v5662_v63, %v5662_v63  ;;  %v5669_v3 = vpop.f32.mrb[42].mxu1  ;;  %v3054_v9 = vadd.f32 %v3053_v23, %v3052_v12  ;;  %v2957_v58 = vsel %vm932_vm2, %v5662_v63, 0.0  ;;  %v3055_v28 = vsel %vm932_vm2, %v3018_v17, 0.0 }
 0x27f   : > { %v5675_v59 = vpop.f32.mrb[43].mxu1  ;;  %v2956_v10 = vadd.f32 %v2955_v33, %v2954_v20  ;;  %v1268_v21 = vadd.f32 %v1267_v39, %v5544_v46  ;;  %v2219_v34 = vadd.f32 %v2218_v31, %v2217_v4  ;;  %v2668_v60 = vrot.slane %v2667_v27, 1 }
 0x280   : > { %v3021_v30 = vmul.f32 %v5675_v59, %v5675_v59  ;;  %v3056_v38 = vadd.f32 %v3055_v28, %v3054_v9  ;;  %v2959_v15 = vsel %vm932_vm2, %v5675_v59, 0.0  ;;  %v3057_v7 = vsel %vm932_vm2, %v3019_v22, 0.0 }
 0x281   : > { %v2958_v51 = vadd.f32 %v2957_v58, %v2956_v10  ;;  %v3059_v37 = vsel %vm932_vm2, %v3020_v57, 0.0  ;;  %v2116_v54 = vrot.slane %v2115_v36, 1  ;;  %v2220_v11 = vadd.f32 %v2219_v34, %v1370_v19 }
 0x282   : > { %v3058_v62 = vadd.f32 %v3057_v7, %v3056_v38  ;;  %v2669_v5 = vadd.f32 %v2668_v60, %v2667_v27  ;;  %v2566_v29 = vrot.slane %v2565_v53, 1  ;;  %v3022_v1 = vmul.f32 %v5658_v0, %v5658_v0 }
 0x283   : > { %v2960_v46 = vadd.f32 %v2959_v15, %v2958_v51  ;;  %v3061_v41 = vsel %vm932_vm2, %v3021_v30, 0.0  ;;  %v2117_v6 = vadd.f32 %v2116_v54, %v2115_v36  ;;  %v2961_v14 = vsel %vm932_vm2, %v5658_v0, 0.0 }
 0x284   : > { %v5688_v8 = vpop.f32.mrb[44].mxu1  ;;  %v3060_v42 = vadd.f32 %v3059_v37, %v3058_v62  ;;  %v5694_v13 = vadd.f32 %v2669_v5, %v2220_v11  ;;  %v3023_v49 = vmul.f32 %v5669_v3, %v5669_v3  ;;  %v2963_v50 = vsel %vm932_vm2, %v5669_v3, 0.0 }
 0x285   : > { %v5692_v39 = vpop.f32.mrb[45].mxu1  ;;  %v2962_v35 = vadd.f32 %v2961_v14, %v2960_v46  ;;  %v2118_v43 = vadd.f32 %v2117_v6, %v1268_v21  ;;  %v2567_v55 = vadd.f32 %v2566_v29, %v2565_v53  ;;  %v3063_v61 = vsel %vm932_vm2, %v3022_v1, 0.0 }
 0x286   : > { %v3024_v44 = vmul.f32 %v5692_v39, %v5692_v39  ;;  %v5700_v56 = vpop.f32.mrb[46].mxu1  ;;  %v3062_v19 = vadd.f32 %v3061_v41, %v3060_v42  ;;  %v2965_v4 = vsel %vm932_vm2, %v5692_v39, 0.0  ;;  %v3065_v27 = vsel %vm932_vm2, %v3023_v49, 0.0 }
 0x287   : > { %v5706_v25 = vpop.f32.mrb[47].mxu1  ;;  %v2964_v17 = vadd.f32 %v2963_v50, %v2962_v35  ;;  %v5713_v36 = vadd.f32 %v2567_v55, %v2118_v43  ;;  %v3026_v20 = vmul.f32 %v5688_v8, %v5688_v8  ;;  %v2969_v33 = vsel %vm932_vm2, %v5688_v8, 0.0 }
 0x288   : > { %v3025_v12 = vmul.f32 %v5706_v25, %v5706_v25  ;;  %v3064_v18 = vadd.f32 %v3063_v61, %v3062_v19  ;;  %v2967_v48 = vsel %vm932_vm2, %v5706_v25, 0.0  ;;  %v3067_v31 = vsel %vm932_vm2, %v3024_v44, 0.0 }
 0x289   : > { %v2966_v2 = vadd.f32 %v2965_v4, %v2964_v17  ;;  %v3027_v10 = vmul.f32 %v5700_v56, %v5700_v56  ;;  %v2971_v34 = vsel %vm932_vm2, %v5700_v56, 0.0 }
 0x28a   : > { %v3066_v22 = vadd.f32 %v3065_v27, %v3064_v18  ;;  %v3069_v57 = vsel %vm932_vm2, %v3025_v12, 0.0 }
 0x28b   : > { %v2968_v23 = vadd.f32 %v2967_v48, %v2966_v2 }
 0x28c   : > { %v3704_v53 = vpop.f32.mrb[48].mxu1  ;;  %v3068_v9 = vadd.f32 %v3067_v31, %v3066_v22 }
 0x28d   : > { %v3863_v58 = vpack.i.bf16 %v3704_v53, %v5589_v16  ;;  %v2879_v28 = vpop.f32.mrb[49].mxu1  ;;  %v2970_v30 = vadd.f32 %v2969_v33, %v2968_v23  ;;  %v3071_v16 = vsel %vm932_vm2, %v3026_v20, 0.0  ;;  %v3030_v6 = vmul.f32 %v3704_v53, %v3704_v53 }
 0x28e   : > { %v3028_v21 = vmul.f32 %v2879_v28, %v2879_v28  ;;  %v3705_v38 = vpop.f32.mrb[50].mxu1  ;;  %v3859_v15 = vpack.i.bf16 %v2879_v28, %v5592_v47  ;;  %v3070_v60 = vadd.f32 %v3069_v57, %v3068_v9  ;;  %v2973_v7 = vsel %vm932_vm2, %v2879_v28, 0.0 }
 0x28f   : > { %v3865_v51 = vpack.i.bf16 %v3705_v38, %v5600_v45  ;;  %v2882_v37 = vpop.f32.mrb[51].mxu1  ;;  %v2972_v54 = vadd.f32 %v2971_v34, %v2970_v30  ;;  %v3073_v47 = vsel %vm932_vm2, %v3027_v10, 0.0  ;;  %v3031_v43 = vmul.f32 %v3705_v38, %v3705_v38 }
 0x290   : > { %v3861_v62 = vpack.i.bf16 %v2882_v37, %v5603_v52  ;;  %3860 = vxpose.xlu0.b32.start [1/16] (narrow) %v3859_v15, 8  ;;  %v3072_v11 = vadd.f32 %v3071_v16, %v3070_v60  ;;  %v2975_v5 = vsel %vm932_vm2, %v2882_v37, 0.0  ;;  %v3029_v29 = vmul.f32 %v2882_v37, %v2882_v37 }
 0x291   : > { %v2974_v1 = vadd.f32 %v2973_v7, %v2972_v54  ;;  %v3075_v46 = vsel %vm932_vm2, %v3028_v21, 0.0  ;;  %v2977_v52 = vsel %vm932_vm2, %v3704_v53, 0.0  ;;  %v2979_v61 = vsel %vm932_vm2, %v3705_v38, 0.0 }
 0x292   : > { %v3074_v41 = vadd.f32 %v3073_v47, %v3072_v11  ;;  %v3077_v45 = vsel %vm932_vm2, %v3029_v29, 0.0  ;;  %v3079_v27 = vsel %vm932_vm2, %v3030_v6, 0.0  ;;  %v3081_v23 = vsel %vm932_vm2, %v3031_v43, 0.0 }
 0x293   : > { %v2976_v14 = vadd.f32 %v2975_v5, %v2974_v1 }
 0x294   : > { %3862 = vxpose.xlu0.b32.cont [2/16] (narrow) %v3861_v62, 8  ;;  %v5736_v42 = vpop.f32.mrb[52].mxu1  ;;  %v3076_v49 = vadd.f32 %v3075_v46, %v3074_v41 }
 0x295   : > { %v3871_v35 = vpack.i.bf16 %v5736_v42, %v5624_v26  ;;  %v2895_v44 = vpop.f32.mrb[53].mxu1  ;;  %v2978_v50 = vadd.f32 %v2977_v52, %v2976_v14  ;;  %v3034_v9 = vmul.f32 %v5736_v42, %v5736_v42 }
 0x296   : > { %v3867_v19 = vpack.i.bf16 %v2895_v44, %v5628_v40  ;;  %v3032_v4 = vmul.f32 %v2895_v44, %v2895_v44  ;;  %v5742_v55 = vpop.f32.mrb[54].mxu1  ;;  %v3078_v17 = vadd.f32 %v3077_v45, %v3076_v49  ;;  %v2981_v12 = vsel %vm932_vm2, %v2895_v44, 0.0 }
 0x297   : > { %v3873_v18 = vpack.i.bf16 %v5742_v55, %v5631_v32  ;;  %v2898_v48 = vpop.f32.mrb[55].mxu1  ;;  %v2980_v2 = vadd.f32 %v2979_v61, %v2978_v50  ;;  %v3035_v15 = vmul.f32 %v5742_v55, %v5742_v55  ;;  %v2987_v37 = vsel %vm932_vm2, %v5742_v55, 0.0 }
 0x298   : > { %v3869_v31 = vpack.i.bf16 %v2898_v48, %v5636_v24  ;;  %3864 = vxpose.xlu0.b32.cont [3/16] (narrow) %v3863_v58, 8  ;;  %v3080_v22 = vadd.f32 %v3079_v27, %v3078_v17  ;;  %v2983_v40 = vsel %vm932_vm2, %v2898_v48, 0.0  ;;  %v3033_v20 = vmul.f32 %v2898_v48, %v2898_v48 }
 0x299   : > { %v2982_v57 = vadd.f32 %v2981_v12, %v2980_v2  ;;  %v3083_v53 = vsel %vm932_vm2, %v3032_v4, 0.0  ;;  %v2985_v24 = vsel %vm932_vm2, %v5736_v42, 0.0  ;;  %v3087_v5 = vsel %vm932_vm2, %v3034_v9, 0.0 }
 0x29a   : > { %v3082_v33 = vadd.f32 %v3081_v23, %v3080_v22  ;;  %v3085_v10 = vsel %vm932_vm2, %v3033_v20, 0.0  ;;  %v3089_v41 = vsel %vm932_vm2, %v3035_v15, 0.0 }
 0x29b   : > { %v2984_v28 = vadd.f32 %v2983_v40, %v2982_v57 }
 0x29c   : > { %3866 = vxpose.xlu0.b32.cont [4/16] (narrow) %v3865_v51, 8  ;;  %v5756_v30 = vpop.f32.mrb[56].mxu1  ;;  %v3084_v58 = vadd.f32 %v3083_v53, %v3082_v33 }
 0x29d   : > { %v3879_v21 = vpack.i.bf16 %v5756_v30, %v5658_v0  ;;  %v5762_v38 = vpop.f32.mrb[57].mxu1  ;;  %v2986_v34 = vadd.f32 %v2985_v24, %v2984_v28  ;;  %v3038_v52 = vmul.f32 %v5756_v30, %v5756_v30 }
 0x29e   : > { %v3875_v60 = vpack.i.bf16 %v5762_v38, %v5662_v63  ;;  %v3036_v7 = vmul.f32 %v5762_v38, %v5762_v38  ;;  %v5770_v51 = vpop.f32.mrb[58].mxu1  ;;  %v3086_v16 = vadd.f32 %v3085_v10, %v3084_v58  ;;  %v2989_v54 = vsel %vm932_vm2, %v5762_v38, 0.0 }
 0x29f   : > { %v3881_v62 = vpack.i.bf16 %v5770_v51, %v5669_v3  ;;  %v2914_v11 = vpop.f32.mrb[59].mxu1  ;;  %v2988_v29 = vadd.f32 %v2987_v37, %v2986_v34  ;;  %v3039_v61 = vmul.f32 %v5770_v51, %v5770_v51  ;;  %v2995_v2 = vsel %vm932_vm2, %v5770_v51, 0.0 }
 0x2a0   : > { %v3877_v63 = vpack.i.bf16 %v2914_v11, %v5675_v59  ;;  %3868 = vxpose.xlu0.b32.cont [5/16] (narrow) %v3867_v19, 8  ;;  %v3088_v47 = vadd.f32 %v3087_v5, %v3086_v16  ;;  %v2991_v1 = vsel %vm932_vm2, %v2914_v11, 0.0  ;;  %v3037_v46 = vmul.f32 %v2914_v11, %v2914_v11 }
 0x2a1   : > { %v2990_v6 = vadd.f32 %v2989_v54, %v2988_v29  ;;  %v3091_v14 = vsel %vm932_vm2, %v3036_v7, 0.0  ;;  %v2993_v59 = vsel %vm932_vm2, %v5756_v30, 0.0  ;;  %v3095_v23 = vsel %vm932_vm2, %v3038_v52, 0.0 }
 0x2a2   : > { %v3090_v45 = vadd.f32 %v3089_v41, %v3088_v47  ;;  %v3093_v44 = vsel %vm932_vm2, %v3037_v46, 0.0  ;;  %v3097_v28 = vsel %vm932_vm2, %v3039_v61, 0.0  ;;  %v3193_v61 = vlaneseq }
 0x2a3   : > { %v2992_v49 = vadd.f32 %v2991_v1, %v2990_v6 }
 0x2a4   : > { %3870 = vxpose.xlu0.b32.cont [6/16] (narrow) %v3869_v31, 8  ;;  %v5786_v43 = vpop.f32.mrb[60].mxu1  ;;  %v3092_v50 = vadd.f32 %v3091_v14, %v3090_v45 }
 0x2a5   : > { %v3887_v19 = vpack.i.bf16 %v5786_v43, %v5688_v8  ;;  %v2927_v4 = vpop.f32.mrb[61].mxu1  ;;  %v2994_v17 = vadd.f32 %v2993_v59, %v2992_v49  ;;  %v3042_v58 = vmul.f32 %v5786_v43, %v5786_v43  ;;  %v3001_v26 = vsel %vm932_vm2, %v5786_v43, 0.0 }
 0x2a6   : > { %v3883_v12 = vpack.i.bf16 %v2927_v4, %v5692_v39  ;;  %v3040_v48 = vmul.f32 %v2927_v4, %v2927_v4  ;;  %v5795_v27 = vpop.f32.mrb[62].mxu1  ;;  %v3094_v31 = vadd.f32 %v3093_v44, %v3092_v50  ;;  %v2997_v22 = vsel %vm932_vm2, %v2927_v4, 0.0 }
 0x2a7   : > { %v3889_v40 = vpack.i.bf16 %v5795_v27, %v5700_v56  ;;  %v2930_v20 = vpop.f32.mrb[63].mxu1  ;;  %v2996_v57 = vadd.f32 %v2995_v2, %v2994_v17  ;;  %v3003_v34 = vsel %vm932_vm2, %v5795_v27, 0.0  ;;  %v3103_v37 = vsel %vm932_vm2, %v3042_v58, 0.0 }
 0x2a8   : > { %v3885_v53 = vpack.i.bf16 %v2930_v20, %v5706_v25  ;;  %3872 = vxpose.xlu0.b32.cont [7/16] (narrow) %v3871_v35, 8  ;;  %v3096_v39 = vadd.f32 %v3095_v23, %v3094_v31  ;;  %v2999_v33 = vsel %vm932_vm2, %v2930_v20, 0.0  ;;  %v3041_v9 = vmul.f32 %v2930_v20, %v2930_v20 }
 0x2a9   : > { %v2998_v10 = vadd.f32 %v2997_v22, %v2996_v57  ;;  %v3099_v24 = vsel %vm932_vm2, %v3040_v48, 0.0  ;;  %v3043_v35 = vmul.f32 %v5795_v27, %v5795_v27 }
 0x2aa   : > { %v3098_v56 = vadd.f32 %v3097_v28, %v3096_v39  ;;  %v3101_v25 = vsel %vm932_vm2, %v3041_v9, 0.0 }
 0x2ab   : > { %v3000_v38 = vadd.f32 %v2999_v33, %v2998_v10  ;;  %v3105_v32 = vsel %vm932_vm2, %v3043_v35, 0.0 }
 0x2ac   : > { %3874 = vxpose.xlu0.b32.cont [8/16] (narrow) %v3873_v18, 8  ;;  %v3100_v42 = vadd.f32 %v3099_v24, %v3098_v56 }
 0x2ad   : > { %v3002_v15 = vadd.f32 %v3001_v26, %v3000_v38 }
 0x2ae   : > { %v3102_v7 = vadd.f32 %v3101_v25, %v3100_v42 }
 0x2af   : > { %v3004_v16 = vadd.f32 %v3003_v34, %v3002_v15 }
 0x2b0   : > { %3876 = vxpose.xlu0.b32.cont [9/16] (narrow) %v3875_v60, 8  ;;  %v3104_v54 = vadd.f32 %v3103_v37, %v3102_v7 }
 0x2b1   : > { %v3005_v55 = vrot.slane %v3004_v16, 4 }
 0x2b2   : > { %v3106_v18 = vadd.f32 %v3105_v32, %v3104_v54 }
 0x2b3   : > { %v3006_v11 = vadd.f32 %v3005_v55, %v3004_v16 }
 0x2b4   : > { %3878 = vxpose.xlu0.b32.cont [10/16] (narrow) %v3877_v63, 8  ;;  %v3107_v5 = vrot.slane %v3106_v18, 4 }
 0x2b5   : > { %v3007_v29 = vrot.slane %v3006_v11, 2 }
 0x2b6   : > { %v3108_v47 = vadd.f32 %v3107_v5, %v3106_v18 }
 0x2b7   : > { %v3008_v1 = vadd.f32 %v3007_v29, %v3006_v11 }
 0x2b8   : > { %3880 = vxpose.xlu0.b32.cont [11/16] (narrow) %v3879_v21, 8  ;;  %v3109_v46 = vrot.slane %v3108_v47, 2 }
 0x2b9   : > { %v3854_v41 = vpop.trf.xlu1  ;;  %v3009_v6 = vrot.slane %v3008_v1, 1 }
 0x2ba   : > { %v3110_v60 = vadd.f32 %v3109_v46, %v3108_v47  ;;  %v3858_v14 = vunpack.i.h.bf16 %v3854_v41  ;;  %v3855_v63 = vunpack.i.l.bf16 %v3854_v41 }
 0x2bb   : > { %v3010_v45 = vadd.f32 %v3009_v6, %v3008_v1 }
 0x2bc   : > { %3882 = vxpose.xlu0.b32.cont [12/16] (narrow) %v3881_v62, 8  ;;  %v3111_v52 = vrot.slane %v3110_v60, 1  ;;  %v3512_v49 = vpack.c.bf16 %v3858_v14, %v3855_v63 }
 0x2bd   : > { %v3011_v44 = vadd.f32 %v3010_v45, %v5713_v36 }
 0x2be   : > { %v3112_v0 = vadd.f32 %v3111_v52, %v3110_v60  ;;  %3481 = vst [vmem:[%s5508_s27 + $0x10] sm:$0xff] %v3512_v49 }
 0x2c0   : > { %3884 = vxpose.xlu0.b32.cont [13/16] (narrow) %v3883_v12, 8  ;;  %v3817_v30 = vpop.trf.xlu0  ;;  %v3113_v21 = vadd.f32 %v3112_v0, %v5694_v13  ;;  %v3194_v13 = vshrl.u32 %v3193_v61, 7 }
 0x2c1   : > { %v3821_v59 = vunpack.i.h.bf16 %v3817_v30  ;;  %v3818_v50 = vunpack.i.l.bf16 %v3817_v30 }
 0x2c2   : > { %3189 = vrot.lane.b32.xlu1 %v3113_v21, %s3965_s6  ;;  %v3198_v17 = vsub.s32 0, %v3194_v13  ;;  %vm3195_vm5 = vcmp.eq.s32.totalorder %v3194_v13, 0  ;;  %s406_s6 = scalar_lea.vmem %s5859_s5, %s3385_s28 }
 0x2c3   : > { %v3511_v3 = vpack.c.bf16 %v3821_v59, %v3818_v50 }
 0x2c4   : > { %3886 = vxpose.xlu0.b32.cont [14/16] (narrow) %v3885_v53, 8 }
 0x2c5   : > { %3458 = vst [vmem:[%s5508_s27 + $0x8] sm:$0xff] %v3511_v3 }
 0x2c8   : > { %3888 = vxpose.xlu0.b32.cont [15/16] (narrow) %v3887_v19, 8 }
 0x2cc   : > { %3890 = vxpose.xlu0.b32.end [16/16] (narrow) %v3889_v40, 8 }
 0x310   : > { %v3891_v36 = vpop.trf.xlu0 }
 0x311   : > { %v3895_v51 = vunpack.i.h.bf16 %v3891_v36  ;;  %v3892_v62 = vunpack.i.l.bf16 %v3891_v36 }
 0x313   : > { %v3513_v4 = vpack.c.bf16 %v3895_v51, %v3892_v62 }
 0x315   : > { %3502 = vst [vmem:[%s5508_s27 + $0x18] sm:$0xff] %v3513_v4 }
 0x334   : > { %v3190_v12 = vpop.permute.xlu1 %3189 }
 0x335   : > { %v3192_v48 = vsel %vm932_vm2, %v3011_v44, %v3190_v12 }
 0x336   : > { %v3199_v8 = vrot.slane %v3192_v48, %v3198_v17 }
 0x338   : > { %v3200_v43 = vsel %vm3195_vm5, %v3199_v8, 0.0 }
 0x339   : > { %3201 = vst.msk [vmem:[%s406_s6] sm:$0xff] %vm1006_vm4, %v3200_v43 }
 0x33a PF: > { %s16_s20 = sadd.s32 1, %s3962_s20   ;;  %s5909_s18 = smov %s3958_s19 }
 0x33b   : > { %p13_p5 = scmp.ge.s32.totalorder %s16_s20, 4   ;;  %s5910_s19 = smov %s5912_s21 }
 0x33d   :  { %15 = sbr.rel (!%p13_p5) target bundleno = 2 (0x2), region = 90 }

</bundles_post_ra>
